<compile_context>
chip_gen: v7x
topology: tpu7x:2x2x1
jax: 0.10.0
libtpu: 0.0.40
codegen_flags: <defaults>
</compile_context>

<pallas_src>
import functools

import jax
import jax.numpy as jnp
from jax import lax
from jax.experimental import pallas as pl
from jax.experimental.pallas import tpu as pltpu

EPS = 1e-5


# ------------------------------ fused kernel -------------------------------- #

def _bottleneck_kernel(x_ref, xres_ref, w1_ref, b1_ref, w2_ref, b2_ref,
                       w3_ref, b3_ref, o_ref, *, h_img, dil):
    """One grid step = one image x one tile of `tr` output rows.

    x_ref    : (tr+2d, Wp, C)  bf16  overlapping row tile of the spatially
                                     padded input (NHWC), includes the halo.
    xres_ref : (tr, W, C)      f32   residual rows (original input).
    w1_ref   : (C, P)          bf16  conv1 weight, BN1 scale folded in.
    b1_ref   : (1, P)          f32   BN1 bias.
    w2_ref   : (3, 3P, P)      bf16  conv2 weight, kh major, K = [kw0|kw1|kw2]*P,
                                     BN2 scale folded in.
    b2_ref   : (1, P)          f32
    w3_ref   : (P, C)          bf16  conv3 weight, BN3 scale folded in.
    b3_ref   : (1, C)          f32
    o_ref    : (tr, W, C)      f32   output rows.
    """
    d = dil
    tr, w_out, _ = o_ref.shape
    base = pl.program_id(1) * tr                     # padded-row index of x_ref[0]

    # ---- stage 1: conv1 (1x1) + BN1 + ReLU, one matmul over the whole tile --- #
    x = x_ref[...]                                                   # (rh, Wp, C)
    y1 = jnp.einsum('rwc,cp->rwp', x, w1_ref[...],
                    preferred_element_type=jnp.float32)
    y1 = jnp.maximum(y1 + b1_ref[...], 0.0)                          # (rh, Wp, P)
    # conv2's zero padding must see *zeros* (conv1(0)+b1 != 0) -> mask the
    # spatial-pad rows/cols of y1 (cheap VPU work, overlaps MXU).
    rows = base + lax.broadcasted_iota(jnp.int32, y1.shape, 0)
    cols = lax.broadcasted_iota(jnp.int32, y1.shape, 1)
    valid = ((rows >= d) & (rows < d + h_img) &
             (cols >= d) & (cols < d + w_out))
    y1 = jnp.where(valid, y1, 0.0).astype(jnp.bfloat16)              # (rh, Wp, P)

    # ---- stage 2: conv2 (3x3, dilation d) via kw-im2col: 3 matmuls, K=3P ----- #
    # Only 2 unaligned sublane (width) slices per tile; kh shifts are cheap
    # leading-dim row slices.  Only the w_out output columns are computed.
    y1cat = jnp.concatenate(
        [y1[:, kw * d: kw * d + w_out, :] for kw in range(3)], axis=-1)   # (rh, W, 3P)
    p_out = w2_ref.shape[-1]
    acc = jnp.zeros((tr, w_out, p_out), jnp.float32)
    for kh in range(3):
        acc = acc + jnp.einsum('rwk,kp->rwp', y1cat[kh * d: kh * d + tr],
                               w2_ref[kh], preferred_element_type=jnp.float32)
    y2 = jnp.maximum(acc + b2_ref[...], 0.0).astype(jnp.bfloat16)         # (tr, W, P)

    # ---- stage 3: conv3 (1x1) + BN3 + residual + ReLU ------------------------ #
    y3 = jnp.einsum('rwp,pc->rwc', y2, w3_ref[...],
                    preferred_element_type=jnp.float32)
    y3 = y3 + b3_ref[...] + xres_ref[...]
    o_ref[...] = jnp.maximum(y3, 0.0).astype(o_ref.dtype)


# ------------------------------- wrapper ------------------------------------ #

def _fold_bn(gamma, beta, mean, var):
    scale = gamma / jnp.sqrt(var + EPS)
    bias = beta - mean * scale
    return scale, bias


def _pick_row_tile(h, cap=32):
    # Largest divisor of H not exceeding `cap`.  (On v5e/v6e this cap -- and
    # vmem_limit_bytes below -- can be raised further; on v7x stay within the
    # 64 MiB physical VMEM.)
    for t in range(min(h, cap), 0, -1):
        if h % t == 0:
            return t
    return h


@functools.partial(jax.jit, static_argnames=("stride", "dilation", "row_tile"))
def bottleneck_forward(x_nchw, params, stride=1, dilation=1, row_tile=None):
    # TODO(synk): stride > 1 / non-None downsample path not implemented
    # (the module's default downsample=None forces stride=1, inplanes=4*planes).
    n, cin, h, w = x_nchw.shape
    p = params["w1"].shape[0]
    c_exp = params["w3"].shape[0]
    assert stride == 1 and cin == c_exp, \
        "identity residual needs stride=1 and inplanes == 4*planes"
    d = dilation
    tr = row_tile if row_tile is not None else _pick_row_tile(h)
    assert h % tr == 0, f"row tile {tr} must divide H={h}"
    n_tiles = h // tr
    wp = w + 2 * d
    rh = tr + 2 * d

    x_nhwc = jnp.transpose(x_nchw, (0, 2, 3, 1))                     # (N, H, W, C)
    xres = x_nhwc                                                    # f32 residual

    # Compute path: spatial pad by d, then gather overlapping (tr+2d)-row tiles
    # so each grid step DMAs exactly the rows conv2 needs (no redundant full
    # "next block" fetch).  bf16 for the MXU.
    xp = jnp.pad(x_nhwc, ((0, 0), (d, d), (d, d), (0, 0))).astype(jnp.bfloat16)
    row_idx = jnp.arange(n_tiles)[:, None] * tr + jnp.arange(rh)[None, :]
    xt = xp[:, row_idx]                                              # (N, T, rh, Wp, C)

    # Fold BN scales into the conv weights (bf16); biases stay separate in f32.
    s1, b1 = _fold_bn(params["g1"], params["b1"], params["m1"], params["v1"])
    s2, b2 = _fold_bn(params["g2"], params["b2"], params["m2"], params["v2"])
    s3, b3 = _fold_bn(params["g3"], params["b3"], params["m3"], params["v3"])
    w1m = (params["w1"][:, :, 0, 0].T * s1[None, :]).astype(jnp.bfloat16)    # (C, P)
    w2t = jnp.transpose(params["w2"], (2, 3, 1, 0)) * s2[None, None, None, :]  # (kh,kw,P,P)
    w2m = w2t.reshape(3, 3 * p, p).astype(jnp.bfloat16)                      # (3, 3P, P)
    w3m = (params["w3"][:, :, 0, 0].T * s3[None, :]).astype(jnp.bfloat16)    # (P, 4P)
    b1 = b1.reshape(1, -1).astype(jnp.float32)
    b2 = b2.reshape(1, -1).astype(jnp.float32)
    b3 = b3.reshape(1, -1).astype(jnp.float32)

    kernel = functools.partial(_bottleneck_kernel, h_img=h, dil=d)
    out_nhwc = pl.pallas_call(
        kernel,
        out_shape=jax.ShapeDtypeStruct((n, h, w, c_exp), jnp.float32),
        grid=(n, n_tiles),
        in_specs=[
            # overlapping (tr+2d)-row tile of the padded input (halo included)
            pl.BlockSpec((None, None, rh, wp, cin), lambda b, i: (b, i, 0, 0, 0)),
            # residual rows (f32; switch to bf16 only if downstream accepts it)
            pl.BlockSpec((None, tr, w, cin), lambda b, i: (b, i, 0, 0)),
            # VMEM-resident weights / biases (constant block index)
            # TODO(synk): on v7x mark these pipeline_mode=pl.Buffered(1) to avoid
            # double-buffering the resident weights.
            pl.BlockSpec((cin, p), lambda b, i: (0, 0)),
            pl.BlockSpec((1, p), lambda b, i: (0, 0)),
            pl.BlockSpec((3, 3 * p, p), lambda b, i: (0, 0, 0)),
            pl.BlockSpec((1, p), lambda b, i: (0, 0)),
            pl.BlockSpec((p, c_exp), lambda b, i: (0, 0)),
            pl.BlockSpec((1, c_exp), lambda b, i: (0, 0)),
        ],
        out_specs=pl.BlockSpec((None, tr, w, c_exp), lambda b, i: (b, i, 0, 0)),
        compiler_params=pltpu.CompilerParams(
            dimension_semantics=("parallel", "parallel"),
            # Safe on all of v5e/v6e/v7x; raise toward ~96 MiB on v5e/v6e when
            # growing tiles (128 MiB physical there, only 64 MiB on v7x).
            vmem_limit_bytes=48 * 1024 * 1024,
        ),
    )(xt, xres, w1m, b1, w2m, b2, w3m, b3)

    return jnp.transpose(out_nhwc, (0, 3, 1, 2))                     # back to NCHW


# ------------------------------ parameters ---------------------------------- #

def make_params(key, inplanes, planes):
    exp = 4
    ks = jax.random.split(key, 16)
    p = {
        # PyTorch conv weight layout: (out, in, kh, kw)
        "w1": 0.1 * jax.random.normal(ks[0], (planes, inplanes, 1, 1), jnp.float32),
        "w2": 0.1 * jax.random.normal(ks[1], (planes, planes, 3, 3), jnp.float32),
        "w3": 0.1 * jax.random.normal(ks[2], (planes * exp, planes, 1, 1), jnp.float32),
    }
    for i, c in enumerate((planes, planes, planes * exp), start=1):
        p[f"g{i}"] = 1.0 + 0.1 * jax.random.normal(ks[3 * i], (c,), jnp.float32)
        p[f"b{i}"] = 0.1 * jax.random.normal(ks[3 * i + 1], (c,), jnp.float32)
        p[f"m{i}"] = 0.1 * jax.random.normal(ks[3 * i + 2], (c,), jnp.float32)
        p[f"v{i}"] = jax.random.uniform(ks[12 + i], (c,), jnp.float32, 0.5, 1.5)
    return p


# ------------------------------ reference ----------------------------------- #

def reference_forward(x, params, stride=1, dilation=1):
    def conv(x, w, stride=1, dilation=1, padding=0):
        return jax.lax.conv_general_dilated(
            x, w, (stride, stride), [(padding, padding)] * 2,
            rhs_dilation=(dilation, dilation),
            dimension_numbers=("NCHW", "OIHW", "NCHW"))

    def bn(x, g, b, m, v):
        sh = (1, -1, 1, 1)
        return (x - m.reshape(sh)) / jnp.sqrt(v.reshape(sh) + EPS) * g.reshape(sh) + b.reshape(sh)

    out = jnp.maximum(bn(conv(x, params["w1"]),
                         params["g1"], params["b1"], params["m1"], params["v1"]), 0.0)
    out = jnp.maximum(bn(conv(out, params["w2"], stride, dilation, dilation),
                         params["g2"], params["b2"], params["m2"], params["v2"]), 0.0)
    out = bn(conv(out, params["w3"]), params["g3"], params["b3"], params["m3"], params["v3"])
    out = jnp.maximum(out + x, 0.0)
    return out


# --------------------------------- main -------------------------------------- #

if __name__ == "__main__":
    key = jax.random.PRNGKey(0)
    k_x, k_p = jax.random.split(key)

    inplanes, planes = 16, 4            # expansion = 4 -> output channels = 16
    n, h, w = 2, 16, 16
    x = jax.random.normal(k_x, (n, inplanes, h, w), jnp.float32)
    params = make_params(k_p, inplanes, planes)

    # row_tile=8 -> 2 row tiles per image: exercises the halo / inter-tile path
    # and gives >=2 parallel grid steps (v7x megacore).
    out = jax.block_until_ready(
        bottleneck_forward(x, params, stride=1, dilation=1, row_tile=8))
    ref = reference_forward(x, params, stride=1, dilation=1)
    assert out.shape == ref.shape == (n, planes * 4, h, w)
    err = float(jnp.max(jnp.abs(out - ref)))
    # bf16 matmul operands (f32 accumulation) -> relaxed tolerance vs. fp32 ref.
    assert jnp.allclose(out, ref, atol=2.5e-2, rtol=2.5e-2), f"max abs err {err}"

    # dilated variant (dilation=2, padding=2), still stride=1 / identity residual.
    out2 = jax.block_until_ready(
        bottleneck_forward(x, params, stride=1, dilation=2, row_tile=8))
    ref2 = reference_forward(x, params, stride=1, dilation=2)
    err2 = float(jnp.max(jnp.abs(out2 - ref2)))
    assert jnp.allclose(out2, ref2, atol=2.5e-2, rtol=2.5e-2), f"max abs err {err2}"

    print("KERNEL_OK")
</pallas_src>

<mosaic_0001>
module attributes {stable_mosaic.version = 11 : i64} {
  func.func @_bottleneck_kernel(%arg0: i32, %arg1: i32, %arg2: memref<1x1x10x18x16xbf16, #tpu.memory_space<vmem>>, %arg3: memref<1x8x16x16xf32, #tpu.memory_space<vmem>>, %arg4: memref<16x4xbf16, #tpu.memory_space<vmem>>, %arg5: memref<1x4xf32, #tpu.memory_space<vmem>>, %arg6: memref<3x12x4xbf16, #tpu.memory_space<vmem>>, %arg7: memref<1x4xf32, #tpu.memory_space<vmem>>, %arg8: memref<4x16xbf16, #tpu.memory_space<vmem>>, %arg9: memref<1x16xf32, #tpu.memory_space<vmem>>, %arg10: memref<1x8x16x16xf32, #tpu.memory_space<vmem>>) attributes {dimension_semantics = [#tpu.dimension_semantics<parallel>, #tpu.dimension_semantics<parallel>], iteration_bounds = array<i64: 2, 2>, scalar_prefetch = 0 : i64, scratch_operands = 0 : i64, tpu.core_type = #tpu.core_type<tc>, window_params = [{transform_indices = @transform_0, window_bounds = array<i64: 1, 1, 10, 18, 16>}, {transform_indices = @transform_1, window_bounds = array<i64: 1, 8, 16, 16>}, {pipeline_mode = #tpu.pipeline_mode<synchronous>, transform_indices = @transform_2, window_bounds = array<i64: 16, 4>}, {pipeline_mode = #tpu.pipeline_mode<synchronous>, transform_indices = @transform_3, window_bounds = array<i64: 1, 4>}, {pipeline_mode = #tpu.pipeline_mode<synchronous>, transform_indices = @transform_4, window_bounds = array<i64: 3, 12, 4>}, {pipeline_mode = #tpu.pipeline_mode<synchronous>, transform_indices = @transform_5, window_bounds = array<i64: 1, 4>}, {pipeline_mode = #tpu.pipeline_mode<synchronous>, transform_indices = @transform_6, window_bounds = array<i64: 4, 16>}, {pipeline_mode = #tpu.pipeline_mode<synchronous>, transform_indices = @transform_7, window_bounds = array<i64: 1, 16>}, {transform_indices = @transform_8, window_bounds = array<i64: 1, 8, 16, 16>}]} {
    %c8_i32 = arith.constant 8 : i32
    %0 = arith.muli %arg1, %c8_i32 : i32
    %c0 = arith.constant 0 : index
    %c0_0 = arith.constant 0 : index
    %c0_1 = arith.constant 0 : index
    %c0_2 = arith.constant 0 : index
    %c0_3 = arith.constant 0 : index
    %1 = vector.load %arg2[%c0, %c0_0, %c0_1, %c0_2, %c0_3] : memref<1x1x10x18x16xbf16, #tpu.memory_space<vmem>>, vector<1x1x10x18x16xbf16>
    %2 = vector.shape_cast %1 : vector<1x1x10x18x16xbf16> to vector<10x18x16xbf16>
    %c0_4 = arith.constant 0 : index
    %c0_5 = arith.constant 0 : index
    %3 = vector.load %arg4[%c0_4, %c0_5] : memref<16x4xbf16, #tpu.memory_space<vmem>>, vector<16x4xbf16>
    "tpu.trace_start"() <{level = 10 : i32, message = "rwc,cp->rwp"}> : () -> ()
    %cst = arith.constant dense<0.000000e+00> : vector<10x18x4xf32>
    %4 = tpu.matmul %2, %3, %cst {dimension_numbers = #tpu.dot_dimension_numbers<[2], [0], [0, 1], [1], [0, 0, 0, 1, 1, 1], [], []>} : vector<10x18x16xbf16>, vector<16x4xbf16>, vector<10x18x4xf32> -> vector<10x18x4xf32>
    "tpu.trace_stop"() : () -> ()
    %c0_6 = arith.constant 0 : index
    %c0_7 = arith.constant 0 : index
    %5 = vector.load %arg5[%c0_6, %c0_7] : memref<1x4xf32, #tpu.memory_space<vmem>>, vector<1x4xf32>
    %6 = vector.shape_cast %5 : vector<1x4xf32> to vector<1x1x4xf32>
    %7 = vector.broadcast %6 : vector<1x1x4xf32> to vector<10x18x4xf32>
    %8 = arith.addf %4, %7 : vector<10x18x4xf32>
    %cst_8 = arith.constant 0.000000e+00 : f32
    %9 = vector.broadcast %cst_8 : f32 to vector<10x18x4xf32>
    %10 = arith.maximumf %8, %9 : vector<10x18x4xf32>
    %11 = tpu.iota {dimensions = array<i32: 0>} : vector<10x18x4xi32>
    %12 = vector.broadcast %0 : i32 to vector<10x18x4xi32>
    %13 = arith.addi %12, %11 : vector<10x18x4xi32>
    %14 = tpu.iota {dimensions = array<i32: 1>} : vector<10x18x4xi32>
    %c1_i32 = arith.constant 1 : i32
    %15 = vector.broadcast %c1_i32 : i32 to vector<10x18x4xi32>
    %16 = arith.cmpi sge, %13, %15 : vector<10x18x4xi32>
    %c17_i32 = arith.constant 17 : i32
    %17 = vector.broadcast %c17_i32 : i32 to vector<10x18x4xi32>
    %18 = arith.cmpi slt, %13, %17 : vector<10x18x4xi32>
    %19 = arith.andi %16, %18 : vector<10x18x4xi1>
    %c1_i32_9 = arith.constant 1 : i32
    %20 = vector.broadcast %c1_i32_9 : i32 to vector<10x18x4xi32>
    %21 = arith.cmpi sge, %14, %20 : vector<10x18x4xi32>
    %22 = arith.andi %19, %21 : vector<10x18x4xi1>
    %c17_i32_10 = arith.constant 17 : i32
    %23 = vector.broadcast %c17_i32_10 : i32 to vector<10x18x4xi32>
    %24 = arith.cmpi slt, %14, %23 : vector<10x18x4xi32>
    %25 = arith.andi %22, %24 : vector<10x18x4xi1>
    %cst_11 = arith.constant 0.000000e+00 : f32
    %26 = vector.broadcast %cst_11 : f32 to vector<10x18x4xf32>
    %27 = arith.select %25, %10, %26 : vector<10x18x4xi1>, vector<10x18x4xf32>
    %28 = arith.truncf %27 : vector<10x18x4xf32> to vector<10x18x4xbf16>
    %29 = vector.extract_strided_slice %28 {offsets = [0, 0, 0], sizes = [10, 16, 4], strides = [1, 1, 1]} : vector<10x18x4xbf16> to vector<10x16x4xbf16>
    %30 = vector.extract_strided_slice %28 {offsets = [0, 1, 0], sizes = [10, 16, 4], strides = [1, 1, 1]} : vector<10x18x4xbf16> to vector<10x16x4xbf16>
    %31 = vector.extract_strided_slice %28 {offsets = [0, 2, 0], sizes = [10, 16, 4], strides = [1, 1, 1]} : vector<10x18x4xbf16> to vector<10x16x4xbf16>
    %32 = tpu.concatenate %29, %30, %31 in 2 : vector<10x16x4xbf16>, vector<10x16x4xbf16>, vector<10x16x4xbf16> -> vector<10x16x12xbf16>
    %cst_12 = arith.constant 0.000000e+00 : f32
    %33 = vector.broadcast %cst_12 : f32 to vector<8x16x4xf32>
    %34 = vector.extract_strided_slice %32 {offsets = [0, 0, 0], sizes = [8, 16, 12], strides = [1, 1, 1]} : vector<10x16x12xbf16> to vector<8x16x12xbf16>
    %c0_13 = arith.constant 0 : index
    %c0_14 = arith.constant 0 : index
    %c0_15 = arith.constant 0 : index
    %35 = vector.load %arg6[%c0_13, %c0_14, %c0_15] : memref<3x12x4xbf16, #tpu.memory_space<vmem>>, vector<1x12x4xbf16>
    %36 = vector.shape_cast %35 : vector<1x12x4xbf16> to vector<12x4xbf16>
    "tpu.trace_start"() <{level = 10 : i32, message = "rwk,kp->rwp"}> : () -> ()
    %cst_16 = arith.constant dense<0.000000e+00> : vector<8x16x4xf32>
    %37 = tpu.matmul %34, %36, %cst_16 {dimension_numbers = #tpu.dot_dimension_numbers<[2], [0], [0, 1], [1], [0, 0, 0, 1, 1, 1], [], []>} : vector<8x16x12xbf16>, vector<12x4xbf16>, vector<8x16x4xf32> -> vector<8x16x4xf32>
    "tpu.trace_stop"() : () -> ()
    %38 = arith.addf %33, %37 : vector<8x16x4xf32>
    %39 = vector.extract_strided_slice %32 {offsets = [1, 0, 0], sizes = [8, 16, 12], strides = [1, 1, 1]} : vector<10x16x12xbf16> to vector<8x16x12xbf16>
    %c1 = arith.constant 1 : index
    %c0_17 = arith.constant 0 : index
    %c0_18 = arith.constant 0 : index
    %40 = vector.load %arg6[%c1, %c0_17, %c0_18] : memref<3x12x4xbf16, #tpu.memory_space<vmem>>, vector<1x12x4xbf16>
    %41 = vector.shape_cast %40 : vector<1x12x4xbf16> to vector<12x4xbf16>
    "tpu.trace_start"() <{level = 10 : i32, message = "rwk,kp->rwp"}> : () -> ()
    %cst_19 = arith.constant dense<0.000000e+00> : vector<8x16x4xf32>
    %42 = tpu.matmul %39, %41, %cst_19 {dimension_numbers = #tpu.dot_dimension_numbers<[2], [0], [0, 1], [1], [0, 0, 0, 1, 1, 1], [], []>} : vector<8x16x12xbf16>, vector<12x4xbf16>, vector<8x16x4xf32> -> vector<8x16x4xf32>
    "tpu.trace_stop"() : () -> ()
    %43 = arith.addf %38, %42 : vector<8x16x4xf32>
    %44 = vector.extract_strided_slice %32 {offsets = [2, 0, 0], sizes = [8, 16, 12], strides = [1, 1, 1]} : vector<10x16x12xbf16> to vector<8x16x12xbf16>
    %c2 = arith.constant 2 : index
    %c0_20 = arith.constant 0 : index
    %c0_21 = arith.constant 0 : index
    %45 = vector.load %arg6[%c2, %c0_20, %c0_21] : memref<3x12x4xbf16, #tpu.memory_space<vmem>>, vector<1x12x4xbf16>
    %46 = vector.shape_cast %45 : vector<1x12x4xbf16> to vector<12x4xbf16>
    "tpu.trace_start"() <{level = 10 : i32, message = "rwk,kp->rwp"}> : () -> ()
    %cst_22 = arith.constant dense<0.000000e+00> : vector<8x16x4xf32>
    %47 = tpu.matmul %44, %46, %cst_22 {dimension_numbers = #tpu.dot_dimension_numbers<[2], [0], [0, 1], [1], [0, 0, 0, 1, 1, 1], [], []>} : vector<8x16x12xbf16>, vector<12x4xbf16>, vector<8x16x4xf32> -> vector<8x16x4xf32>
    "tpu.trace_stop"() : () -> ()
    %48 = arith.addf %43, %47 : vector<8x16x4xf32>
    %c0_23 = arith.constant 0 : index
    %c0_24 = arith.constant 0 : index
    %49 = vector.load %arg7[%c0_23, %c0_24] : memref<1x4xf32, #tpu.memory_space<vmem>>, vector<1x4xf32>
    %50 = vector.shape_cast %49 : vector<1x4xf32> to vector<1x1x4xf32>
    %51 = vector.broadcast %50 : vector<1x1x4xf32> to vector<8x16x4xf32>
    %52 = arith.addf %48, %51 : vector<8x16x4xf32>
    %cst_25 = arith.constant 0.000000e+00 : f32
    %53 = vector.broadcast %cst_25 : f32 to vector<8x16x4xf32>
    %54 = arith.maximumf %52, %53 : vector<8x16x4xf32>
    %55 = arith.truncf %54 : vector<8x16x4xf32> to vector<8x16x4xbf16>
    %c0_26 = arith.constant 0 : index
    %c0_27 = arith.constant 0 : index
    %56 = vector.load %arg8[%c0_26, %c0_27] : memref<4x16xbf16, #tpu.memory_space<vmem>>, vector<4x16xbf16>
    "tpu.trace_start"() <{level = 10 : i32, message = "rwp,pc->rwc"}> : () -> ()
    %cst_28 = arith.constant dense<0.000000e+00> : vector<8x16x16xf32>
    %57 = tpu.matmul %55, %56, %cst_28 {dimension_numbers = #tpu.dot_dimension_numbers<[2], [0], [0, 1], [1], [0, 0, 0, 1, 1, 1], [], []>} : vector<8x16x4xbf16>, vector<4x16xbf16>, vector<8x16x16xf32> -> vector<8x16x16xf32>
    "tpu.trace_stop"() : () -> ()
    %c0_29 = arith.constant 0 : index
    %c0_30 = arith.constant 0 : index
    %58 = vector.load %arg9[%c0_29, %c0_30] : memref<1x16xf32, #tpu.memory_space<vmem>>, vector<1x16xf32>
    %59 = vector.shape_cast %58 : vector<1x16xf32> to vector<1x1x16xf32>
    %60 = vector.broadcast %59 : vector<1x1x16xf32> to vector<8x16x16xf32>
    %61 = arith.addf %57, %60 : vector<8x16x16xf32>
    %c0_31 = arith.constant 0 : index
    %c0_32 = arith.constant 0 : index
    %c0_33 = arith.constant 0 : index
    %c0_34 = arith.constant 0 : index
    %62 = vector.load %arg3[%c0_31, %c0_32, %c0_33, %c0_34] : memref<1x8x16x16xf32, #tpu.memory_space<vmem>>, vector<1x8x16x16xf32>
    %63 = vector.shape_cast %62 : vector<1x8x16x16xf32> to vector<8x16x16xf32>
    %64 = arith.addf %61, %63 : vector<8x16x16xf32>
    %cst_35 = arith.constant 0.000000e+00 : f32
    %65 = vector.broadcast %cst_35 : f32 to vector<8x16x16xf32>
    %66 = arith.maximumf %64, %65 : vector<8x16x16xf32>
    %c0_36 = arith.constant 0 : index
    %c0_37 = arith.constant 0 : index
    %c0_38 = arith.constant 0 : index
    %c0_39 = arith.constant 0 : index
    %67 = vector.load %arg10[%c0_36, %c0_37, %c0_38, %c0_39] : memref<1x8x16x16xf32, #tpu.memory_space<vmem>>, vector<1x8x16x16xf32>
    %68 = vector.shape_cast %67 : vector<1x8x16x16xf32> to vector<8x16x16xf32>
    %69 = vector.shape_cast %66 : vector<8x16x16xf32> to vector<1x8x16x16xf32>
    tpu.vector_store %arg10[%c0_36, %c0_37, %c0_38, %c0_39], %69 {strides = array<i32>} : memref<1x8x16x16xf32, #tpu.memory_space<vmem>>, vector<1x8x16x16xf32>,
    return
  }
  func.func @transform_0(%arg0: i32, %arg1: i32) -> (i32, i32, i32, i32, i32) {
    %c0_i32 = arith.constant 0 : i32
    %c0_i32_0 = arith.constant 0 : i32
    %c0_i32_1 = arith.constant 0 : i32
    %c0_i32_2 = arith.constant 0 : i32
    return %arg0, %arg1, %c0_i32, %c0_i32_0, %c0_i32_1 : i32, i32, i32, i32, i32
  }
  func.func @transform_1(%arg0: i32, %arg1: i32) -> (i32, i32, i32, i32) {
    %c0_i32 = arith.constant 0 : i32
    %c0_i32_0 = arith.constant 0 : i32
    %c0_i32_1 = arith.constant 0 : i32
    return %arg0, %arg1, %c0_i32, %c0_i32_0 : i32, i32, i32, i32
  }
  func.func @transform_2(%arg0: i32, %arg1: i32) -> (i32, i32) {
    %c0_i32 = arith.constant 0 : i32
    %c0_i32_0 = arith.constant 0 : i32
    %c0_i32_1 = arith.constant 0 : i32
    return %c0_i32, %c0_i32_0 : i32, i32
  }
  func.func @transform_3(%arg0: i32, %arg1: i32) -> (i32, i32) {
    %c0_i32 = arith.constant 0 : i32
    %c0_i32_0 = arith.constant 0 : i32
    %c0_i32_1 = arith.constant 0 : i32
    return %c0_i32, %c0_i32_0 : i32, i32
  }
  func.func @transform_4(%arg0: i32, %arg1: i32) -> (i32, i32, i32) {
    %c0_i32 = arith.constant 0 : i32
    %c0_i32_0 = arith.constant 0 : i32
    %c0_i32_1 = arith.constant 0 : i32
    %c0_i32_2 = arith.constant 0 : i32
    return %c0_i32, %c0_i32_0, %c0_i32_1 : i32, i32, i32
  }
  func.func @transform_5(%arg0: i32, %arg1: i32) -> (i32, i32) {
    %c0_i32 = arith.constant 0 : i32
    %c0_i32_0 = arith.constant 0 : i32
    %c0_i32_1 = arith.constant 0 : i32
    return %c0_i32, %c0_i32_0 : i32, i32
  }
  func.func @transform_6(%arg0: i32, %arg1: i32) -> (i32, i32) {
    %c0_i32 = arith.constant 0 : i32
    %c0_i32_0 = arith.constant 0 : i32
    %c0_i32_1 = arith.constant 0 : i32
    return %c0_i32, %c0_i32_0 : i32, i32
  }
  func.func @transform_7(%arg0: i32, %arg1: i32) -> (i32, i32) {
    %c0_i32 = arith.constant 0 : i32
    %c0_i32_0 = arith.constant 0 : i32
    %c0_i32_1 = arith.constant 0 : i32
    return %c0_i32, %c0_i32_0 : i32, i32
  }
  func.func @transform_8(%arg0: i32, %arg1: i32) -> (i32, i32, i32, i32) {
    %c0_i32 = arith.constant 0 : i32
    %c0_i32_0 = arith.constant 0 : i32
    %c0_i32_1 = arith.constant 0 : i32
    return %arg0, %arg1, %c0_i32, %c0_i32_0 : i32, i32, i32, i32
  }
}

</mosaic_0001>

<bundles_post_ra>
// kernel: bottleneck_forward.1
= control target key start
LH: loop header
LB: loop body
LE: loop exit
PB: predicated region body
PF: predicated region fallthrough
CT: control target
= control target key end

     0   :  { %s4562_s27 = smov 0   ;;  %s4564_s28 = smov 0   ;;  %s5642_s0 = inlined_call_operand.vmem [shape: bf16[2,2,10,18,16], index: 0, kind: input, shape index: {}]   ;;  %s5643_s1 = inlined_call_operand.vmem [shape: f32[2,16,16,16], index: 1, kind: input, shape index: {}]   ;;  %s5644_s2 = inlined_call_operand.vmem [shape: bf16[16,4], index: 2, kind: input, shape index: {}]   ;;  %s5645_s3 = inlined_call_operand.vmem [shape: f32[1,4], index: 3, kind: input, shape index: {}]   ;;  %s5646_s4 = inlined_call_operand.vmem [shape: bf16[3,12,4], index: 4, kind: input, shape index: {}]   ;;  %s5647_s5 = inlined_call_operand.vmem [shape: f32[1,4], index: 5, kind: input, shape index: {}]   ;;  %s5648_s6 = inlined_call_operand.vmem [shape: bf16[4,16], index: 6, kind: input, shape index: {}]   ;;  %s5649_s7 = inlined_call_operand.vmem [shape: f32[1,16], index: 7, kind: input, shape index: {}]   ;;  %s5650_s8 = inlined_call_operand.vmem [shape: f32[2,16,16,16], index: 8, kind: output, shape index: {}]  }
   0x1   :  { %s4566_s29 = smov 0   ;;  %s4568_s30 = smov 0  }
   0x2   :  { %s4570_s9 = smov 0  }
   0x3 LB: > { %s27_s10 = sadd.s32 1, %s4503_s29  ;;  %s30_s11 = sadd.s32 1, %s4507_s30  ;;  %s4511_s9 = sphi %s4570_s9, %s18_s9   ;;  %s4507_s30 = sphi %s4568_s30, %s5702_s30   ;;  %s4503_s29 = sphi %s4566_s29, %s5701_s29   ;;  %s4499_s28 = sphi %s4564_s28, %s5700_s28   ;;  %s4495_s27 = sphi %s4562_s27, %s5699_s27  }
   0x4   : > { %p28_p0 = scmp.ge.s32.totalorder %s27_s10, 2  ;;  %p4129_p1 = scmp.ge.s32.totalorder %s4511_s9, 1 }
   0x5   : > { %p300_p2 = scmp.lt.s32.totalorder %s4511_s9, 5 }
   0x6   : > { %s5704_s10 = smov (%p28_p0, %s27_s10), 0  ;;  %s5706_s11 = smov (!%p28_p0, %s30_s11), %s4507_s30 }
   0x7   : > { %p301_p3 = pnand %p4129_p1, %p300_p2  ;;  %p32_p4 = scmp.ge.s32.totalorder %s5706_s11, 2 }
   0x9   : > { %s5708_s11 = smov (%p32_p4, %s5706_s11), 0  ;;  %304 = sbr.rel (%p301_p3) target bundleno = 1003 (0x3eb), region = 52 }
  0x10   : > { %v4469_v0 = vld [vmem:[%s5644_s2] sm:$0xff]   ;;  %p353_p5 = scmp.lt.s32.totalorder %s4499_s28, 1  ;;  %v465_v1 = vlaneseq  ;;  %p355_p6 = scmp.lt.s32.totalorder %s4495_s27, 1  ;;  %v4513_v2 = vmov 1966171168   ;;  %vm1706_vm0 = vcmask 130048  }
  0x11   : > { %4286 = vmatprep.subr.bf16.mxu0 %v4469_v0  ;;  %v463_v3 = vunpack.c.l.s4 %v4513_v2  ;;  %s4792_s24 = sshll.u32 %s4495_s27, 3  ;;  %s4515_s25 = smov 8  }
  0x12   : > { %s5710_s28 = smov (!%p353_p5, %s4499_s28), 1  ;;  %4287 = vmatpush3.bf16.msra.mxu0 %v4469_v0  ;;  %v4601_v4 = vshrl.u32 %v465_v1, 7  ;;  %s4516_s26 = smov 4  }
  0x13   : > { %s356_s14 = scalar_select %p355_p6, %s4495_s27, 1  ;;  %v464_v5 = vunpack.c.0.s8 %v463_v3 }
  0x14   : > { %s4424_s15 = smul.u32 60, %s5710_s28  ;;  %vm2500_vm4 = vcmp.ge.s32.totalorder %v4601_v4, 1  ;;  %p365_p7 = scmp.lt.s32.totalorder %s4792_s24, 15 }
  0x15   : > { %s4423_s16 = smul.u32 30, %s356_s14  ;;  %v4605_v6 = vsub.s32 %v464_v5, %v4601_v4  ;;  %s4133_s22 = sshll.u32 %s5710_s28, 5 }
  0x17   : > { %s359_s17 = sadd.s32 %s4424_s15, %s4423_s16 }
  0x18   : > { %s4130_s18 = sshll.u32 %s359_s17, 2 }
  0x19   : > { %s4610_s21 = scalar_lea.vmem %s5642_s0, %s4130_s18 }
  0x1a   : > { %v4141_v7 = vld.sshfl [vmem:[%s4610_s21] sm:$0x33 pattern:$0x75316420] }
  0x1b   : > { %v4142_v8 = vld.sshfl [vmem:[%s4610_s21 + $0x4] sm:$0x33 pattern:$0x75316420]  ;;  %v461_v9 = vcombine.high %v4141_v7, %v4141_v7  ;;  %v468_v10 = vrot.slane %v4141_v7, %v4605_v6 }
  0x1c   : > { %v485_v11 = vcombine.high %v4142_v8, %v4142_v8  ;;  %v492_v12 = vrot.slane %v4142_v8, %v4605_v6  ;;  %v4143_v13 = vld.sshfl [vmem:[%s4610_s21 + $0x8] sm:$0x1 pattern:$0x75316420] }
  0x1d   : > { %v475_v14 = vrot.slane %v461_v9, %v4605_v6  ;;  %v4144_v15 = vld.sshfl [vmem:[%s4610_s21 + $0xc] sm:$0x33 pattern:$0x75316420]  ;;  %v515_v18 = vrot.slane %v4143_v13, %v4605_v6 }
  0x1e   : > { %v499_v16 = vrot.slane %v485_v11, %v4605_v6  ;;  %v4145_v17 = vld.sshfl [vmem:[%s4610_s21 + $0x10] sm:$0x33 pattern:$0x75316420]  ;;  %v523_v19 = vcombine.high %v4144_v15, %v4144_v15  ;;  %v530_v20 = vrot.slane %v4144_v15, %v4605_v6 }
  0x1f   : > { %v1091_v21 = vcombine.low %v468_v10, %v475_v14  ;;  %v4171_v22 = vcombine.high %v468_v10, %v475_v14  ;;  %v547_v23 = vcombine.high %v4145_v17, %v4145_v17  ;;  %v554_v24 = vrot.slane %v4145_v17, %v4605_v6  ;;  %v4146_v33 = vld.sshfl [vmem:[%s4610_s21 + $0x14] sm:$0x1 pattern:$0x75316420] }
  0x20   : > { %v1093_v25 = vcombine.low %v492_v12, %v499_v16  ;;  %v4172_v26 = vcombine.high %v492_v12, %v499_v16  ;;  %v537_v27 = vrot.slane %v523_v19, %v4605_v6  ;;  %v538_v28 = vcombine.high %v530_v20, %v530_v20  ;;  %v4147_v38 = vld.sshfl [vmem:[%s4610_s21 + $0x18] sm:$0x33 pattern:$0x75316420] }
  0x21   : > { %v1101_v29 = vrot.slane %v1091_v21, %v4605_v6  ;;  %v1108_v30 = vrot.slane %v4171_v22, %v4605_v6  ;;  %v561_v31 = vrot.slane %v547_v23, %v4605_v6  ;;  %v562_v32 = vcombine.high %v554_v24, %v554_v24  ;;  %v4148_v42 = vld.sshfl [vmem:[%s4610_s21 + $0x1c] sm:$0x33 pattern:$0x75316420] }
  0x22   : > { %v1115_v34 = vrot.slane %v1093_v25, %v4605_v6  ;;  %v1122_v35 = vrot.slane %v4172_v26, %v4605_v6  ;;  %v539_v36 = vcombine.high %v537_v27, %v537_v27  ;;  %v1140_v37 = vcombine.low %v515_v18, %v530_v20  ;;  %v4149_v52 = vld.sshfl [vmem:[%s4610_s21 + $0x20] sm:$0x1 pattern:$0x75316420] }
  0x23   : > { %v1123_v39 = vcombine.low %v1101_v29, %v1108_v30  ;;  %v1141_v40 = vcombine.low %v537_v27, %v538_v28  ;;  %v1143_v41 = vcombine.low %v561_v31, %v562_v32  ;;  %v563_v43 = vcombine.high %v561_v31, %v561_v31  ;;  %v4150_v61 = vld.sshfl [vmem:[%s4610_s21 + $0x24] sm:$0x33 pattern:$0x75316420] }
  0x24   : > { %v1124_v44 = vcombine.low %v1115_v34, %v1122_v35  ;;  %v1142_v45 = vcombine.low %v539_v36, %v554_v24  ;;  %v1150_v46 = vrot.slane %v1140_v37, %v4605_v6  ;;  %v577_v47 = vrot.slane %v4146_v33, %v4605_v6  ;;  %v4151_v1 = vld.sshfl [vmem:[%s4610_s21 + $0x28] sm:$0x33 pattern:$0x75316420] }
  0x25   : > { %v1131_v48 = vrot.slane %v1123_v39, %v4605_v6  ;;  %v1157_v49 = vrot.slane %v1141_v40, %v4605_v6  ;;  %v1171_v50 = vrot.slane %v1143_v41, %v4605_v6  ;;  %v585_v51 = vcombine.high %v4147_v38, %v4147_v38  ;;  %v4152_v21 = vld.sshfl [vmem:[%s4610_s21 + $0x2c] sm:$0x1 pattern:$0x75316420] }
  0x26   : > { %v1138_v53 = vrot.slane %v1124_v44, %v4605_v6  ;;  %v1164_v54 = vrot.slane %v1142_v45, %v4605_v6  ;;  %v592_v55 = vrot.slane %v4147_v38, %v4605_v6  ;;  %v609_v56 = vcombine.high %v4148_v42, %v4148_v42  ;;  %v4153_v25 = vld.sshfl [vmem:[%s4610_s21 + $0x30] sm:$0x33 pattern:$0x75316420] }
  0x27   : > { %v1172_v57 = vcombine.low %v1150_v46, %v1157_v49  ;;  %v599_v58 = vrot.slane %v585_v51, %v4605_v6  ;;  %v616_v59 = vrot.slane %v4148_v42, %v4605_v6  ;;  %v1189_v60 = vcombine.low %v563_v43, %v577_v47  ;;  %v4154_v35 = vld.sshfl [vmem:[%s4610_s21 + $0x34] sm:$0x33 pattern:$0x75316420] }
  0x28   : > { %v1139_v62 = vcombine.low %v1131_v48, %v1138_v53  ;;  %v1173_v63 = vcombine.low %v1164_v54, %v1171_v50  ;;  %v623_v0 = vrot.slane %v609_v56, %v4605_v6  ;;  %v639_v2 = vrot.slane %v4149_v52, %v4605_v6  ;;  %v4155_v44 = vld.sshfl [vmem:[%s4610_s21 + $0x38] sm:$0x1 pattern:$0x75316420] }
  0x29   : > { %v1180_v3 = vrot.slane %v1172_v57, %v4605_v6  ;;  %v1190_v5 = vcombine.low %v592_v55, %v599_v58  ;;  %v4173_v7 = vcombine.high %v592_v55, %v599_v58  ;;  %v1199_v8 = vrot.slane %v1189_v60, %v4605_v6  ;;  %v4156_v48 = vld.sshfl [vmem:[%s4610_s21 + $0x3c] sm:$0x33 pattern:$0x75316420] }
  0x2a   : > { %4288 = vmatprep.mubr.msk.bf16.mxu0 %vm1706_vm0, %v1139_v62  ;;  %v1187_v9 = vrot.slane %v1173_v63, %v4605_v6  ;;  %v1192_v10 = vcombine.low %v616_v59, %v623_v0  ;;  %v647_v11 = vcombine.high %v4150_v61, %v4150_v61  ;;  %v654_v12 = vrot.slane %v4150_v61, %v4605_v6 }
  0x2b   : > { %v1206_v13 = vrot.slane %v1190_v5, %v4605_v6  ;;  %v1213_v14 = vrot.slane %v4173_v7, %v4605_v6  ;;  %v678_v15 = vrot.slane %v4151_v1, %v4605_v6  ;;  %v4174_v16 = vcombine.high %v616_v59, %v623_v0 }
  0x2c   : > { %v1188_v17 = vcombine.low %v1180_v3, %v1187_v9  ;;  %v1220_v18 = vrot.slane %v1192_v10, %v4605_v6  ;;  %v661_v19 = vrot.slane %v647_v11, %v4605_v6  ;;  %v662_v20 = vcombine.high %v654_v12, %v654_v12  ;;  %v4158_v9 = vld.sshfl [vmem:[%s4610_s21 + $0x44] sm:$0x1 pattern:$0x75316420] }
  0x2d   : > { %v1221_v22 = vcombine.low %v1199_v8, %v1206_v13  ;;  %v1239_v23 = vcombine.low %v639_v2, %v654_v12  ;;  %v1248_v24 = vrot.slane %v4174_v16, %v4605_v6  ;;  %v671_v26 = vcombine.high %v4151_v1, %v4151_v1  ;;  %v4157_v2 = vld.sshfl [vmem:[%s4610_s21 + $0x40] sm:$0x33 pattern:$0x75316420] }
  0x2e   : > { %4289 = vmatmul.mubr.msk.bf16.vlgmr.msra.gmra.mrb[0].mxu0 %vm1706_vm0, %v1188_v17  ;;  %v1222_v27 = vcombine.low %v1213_v14, %v1220_v18  ;;  %v663_v28 = vcombine.high %v661_v19, %v661_v19  ;;  %v1240_v29 = vcombine.low %v661_v19, %v662_v20  ;;  %v686_v30 = vcombine.high %v678_v15, %v678_v15  ;;  %v4159_v14 = vld.sshfl [vmem:[%s4610_s21 + $0x48] sm:$0x33 pattern:$0x75316420] }
  0x2f   : > { %v1229_v31 = vrot.slane %v1221_v22, %v4605_v6  ;;  %v1255_v32 = vrot.slane %v1239_v23, %v4605_v6  ;;  %v685_v33 = vrot.slane %v671_v26, %v4605_v6  ;;  %v701_v34 = vrot.slane %v4152_v21, %v4605_v6 }
  0x30   : > { %v1236_v36 = vrot.slane %v1222_v27, %v4605_v6  ;;  %v1241_v37 = vcombine.low %v663_v28, %v678_v15  ;;  %v1262_v38 = vrot.slane %v1240_v29, %v4605_v6  ;;  %v709_v39 = vcombine.high %v4153_v25, %v4153_v25  ;;  %v4160_v27 = vld.sshfl [vmem:[%s4610_s21 + $0x4c] sm:$0x33 pattern:$0x75316420] }
  0x31   : > { %v1270_v40 = vcombine.low %v1248_v24, %v1255_v32  ;;  %v687_v41 = vcombine.high %v685_v33, %v685_v33  ;;  %v716_v42 = vrot.slane %v4153_v25, %v4605_v6  ;;  %v1287_v43 = vcombine.low %v685_v33, %v686_v30  ;;  %v4161_v32 = vld.sshfl [vmem:[%s4610_s21 + $0x50] sm:$0x1 pattern:$0x75316420] }
  0x32   : > { %v1237_v45 = vcombine.low %v1229_v31, %v1236_v36  ;;  %v1269_v46 = vrot.slane %v1241_v37, %v4605_v6  ;;  %v723_v47 = vrot.slane %v709_v39, %v4605_v6  ;;  %v733_v49 = vcombine.high %v4154_v35, %v4154_v35  ;;  %v4162_v37 = vld.sshfl [vmem:[%s4610_s21 + $0x54] sm:$0x33 pattern:$0x75316420] }
  0x33   : > { %v1278_v50 = vrot.slane %v1270_v40, %v4605_v6  ;;  %v1288_v51 = vcombine.low %v687_v41, %v701_v34  ;;  %v1297_v52 = vrot.slane %v1287_v43, %v4605_v6  ;;  %v740_v53 = vrot.slane %v4154_v35, %v4605_v6 }
  0x34   : > { %4292 = vmatprep.mubr.msk.bf16.mxu0 %vm1706_vm0, %v1237_v45  ;;  %v1271_v54 = vcombine.low %v1262_v38, %v1269_v46  ;;  %v1289_v55 = vcombine.low %v716_v42, %v723_v47  ;;  %v4175_v56 = vcombine.high %v716_v42, %v723_v47  ;;  %v747_v57 = vrot.slane %v733_v49, %v4605_v6 }
  0x35   : > { %v1304_v58 = vrot.slane %v1288_v51, %v4605_v6  ;;  %v763_v59 = vrot.slane %v4155_v44, %v4605_v6  ;;  %v771_v60 = vcombine.high %v4156_v48, %v4156_v48  ;;  %v778_v61 = vrot.slane %v4156_v48, %v4605_v6 }
  0x36   : > { %v1285_v62 = vrot.slane %v1271_v54, %v4605_v6  ;;  %v1311_v63 = vrot.slane %v1289_v55, %v4605_v6  ;;  %v1318_v0 = vrot.slane %v4175_v56, %v4605_v6  ;;  %v1336_v1 = vcombine.low %v740_v53, %v747_v57 }
  0x37   : > { %v1319_v3 = vcombine.low %v1297_v52, %v1304_v58  ;;  %v785_v5 = vrot.slane %v771_v60, %v4605_v6  ;;  %v786_v7 = vcombine.high %v778_v61, %v778_v61  ;;  %v4176_v8 = vcombine.high %v740_v53, %v747_v57  ;;  %v4163_v58 = vld.sshfl [vmem:[%s4610_s21 + $0x58] sm:$0x33 pattern:$0x75316420] }
  0x38   : > { %v1286_v10 = vcombine.low %v1278_v50, %v1285_v62  ;;  %v1320_v11 = vcombine.low %v1311_v63, %v1318_v0  ;;  %v1338_v12 = vcombine.low %v763_v59, %v778_v61  ;;  %v1346_v13 = vrot.slane %v1336_v1, %v4605_v6  ;;  %v4164_v61 = vld.sshfl [vmem:[%s4610_s21 + $0x5c] sm:$0x1 pattern:$0x75316420] }
  0x39   : > { %v1327_v15 = vrot.slane %v1319_v3, %v4605_v6  ;;  %v1339_v16 = vcombine.low %v785_v5, %v786_v7  ;;  %v1353_v17 = vrot.slane %v4176_v8, %v4605_v6  ;;  %v787_v18 = vcombine.high %v785_v5, %v785_v5 }
  0x3a   : > { %4293 = vmatmul.mubr.msk.bf16.gmra.mrb[4].mxu0 %vm1706_vm0, %v1286_v10  ;;  %v1334_v19 = vrot.slane %v1320_v11, %v4605_v6  ;;  %v1360_v20 = vrot.slane %v1338_v12, %v4605_v6  ;;  %v795_v21 = vcombine.high %v4157_v2, %v4157_v2  ;;  %v802_v22 = vrot.slane %v4157_v2, %v4605_v6  ;;  %v4165_v10 = vld.sshfl [vmem:[%s4610_s21 + $0x60] sm:$0x33 pattern:$0x75316420] }
  0x3b   : > { %v1367_v23 = vrot.slane %v1339_v16, %v4605_v6  ;;  %v1368_v24 = vcombine.low %v1346_v13, %v1353_v17  ;;  %v825_v25 = vrot.slane %v4158_v9, %v4605_v6  ;;  %v833_v26 = vcombine.high %v4159_v14, %v4159_v14 }
  0x3c   : > { %v1335_v28 = vcombine.low %v1327_v15, %v1334_v19  ;;  %v809_v29 = vrot.slane %v795_v21, %v4605_v6  ;;  %v810_v30 = vcombine.high %v802_v22, %v802_v22  ;;  %v840_v31 = vrot.slane %v4159_v14, %v4605_v6  ;;  %v4166_v19 = vld.sshfl [vmem:[%s4610_s21 + $0x64] sm:$0x33 pattern:$0x75316420] }
  0x3d   : > { %v1369_v33 = vcombine.low %v1360_v20, %v1367_v23  ;;  %v1376_v34 = vrot.slane %v1368_v24, %v4605_v6  ;;  %v847_v35 = vrot.slane %v833_v26, %v4605_v6  ;;  %v1385_v36 = vcombine.low %v787_v18, %v802_v22 }
  0x3e   : > { %4296 = vmatprep.mubr.msk.bf16.mxu0 %vm1706_vm0, %v1335_v28  ;;  %v811_v38 = vcombine.high %v809_v29, %v809_v29  ;;  %v1386_v39 = vcombine.low %v809_v29, %v810_v30  ;;  %v857_v40 = vcombine.high %v4160_v27, %v4160_v27  ;;  %v864_v41 = vrot.slane %v4160_v27, %v4605_v6  ;;  %v4167_v28 = vld.sshfl [vmem:[%s4610_s21 + $0x68] sm:$0x1 pattern:$0x75316420] }
  0x3f   : > { %v1383_v42 = vrot.slane %v1369_v33, %v4605_v6  ;;  %v1388_v43 = vcombine.low %v840_v31, %v847_v35  ;;  %v1395_v44 = vrot.slane %v1385_v36, %v4605_v6  ;;  %v887_v45 = vrot.slane %v4161_v32, %v4605_v6  ;;  %v4168_v33 = vld.sshfl [vmem:[%s4610_s21 + $0x6c] sm:$0x33 pattern:$0x75316420] }
  0x40   : > { %v1387_v46 = vcombine.low %v811_v38, %v825_v25  ;;  %v1402_v47 = vrot.slane %v1386_v39, %v4605_v6  ;;  %v871_v48 = vrot.slane %v857_v40, %v4605_v6  ;;  %v902_v49 = vrot.slane %v4162_v37, %v4605_v6 }
  0x41   : > { %v1384_v50 = vcombine.low %v1376_v34, %v1383_v42  ;;  %v1416_v51 = vrot.slane %v1388_v43, %v4605_v6  ;;  %v4177_v52 = vcombine.high %v840_v31, %v847_v35  ;;  %v895_v53 = vcombine.high %v4162_v37, %v4162_v37 }
  0x42   : > { %v1409_v54 = vrot.slane %v1387_v46, %v4605_v6  ;;  %v1417_v55 = vcombine.low %v1395_v44, %v1402_v47  ;;  %v1435_v56 = vcombine.low %v864_v41, %v871_v48  ;;  %v4178_v57 = vcombine.high %v864_v41, %v871_v48  ;;  %v4169_v41 = vld.sshfl [vmem:[%s4610_s21 + $0x70] sm:$0x33 pattern:$0x75316420] }
  0x43   : > { %4297 = vmatmul.mubr.msk.bf16.gmra.mrb[8].mxu0 %vm1706_vm0, %v1384_v50  ;;  %v1437_v59 = vcombine.low %v887_v45, %v902_v49  ;;  %v1444_v60 = vrot.slane %v4177_v52, %v4605_v6  ;;  %v909_v62 = vrot.slane %v895_v53, %v4605_v6  ;;  %v910_v63 = vcombine.high %v902_v49, %v902_v49 }
  0x44   : > { %v1418_v0 = vcombine.low %v1409_v54, %v1416_v51  ;;  %v1425_v1 = vrot.slane %v1417_v55, %v4605_v6  ;;  %v1451_v2 = vrot.slane %v1435_v56, %v4605_v6  ;;  %v1458_v3 = vrot.slane %v4178_v57, %v4605_v6 }
  0x45   : > { %v1465_v5 = vrot.slane %v1437_v59, %v4605_v6  ;;  %v911_v7 = vcombine.high %v909_v62, %v909_v62  ;;  %v919_v8 = vcombine.high %v4163_v58, %v4163_v58  ;;  %v926_v9 = vrot.slane %v4163_v58, %v4605_v6 }
  0x46   : > { %v1432_v11 = vrot.slane %v1418_v0, %v4605_v6  ;;  %v1466_v12 = vcombine.low %v1444_v60, %v1451_v2  ;;  %v949_v13 = vrot.slane %v4164_v61, %v4605_v6  ;;  %v1483_v14 = vcombine.low %v909_v62, %v910_v63  ;;  %v4170_v63 = vld.sshfl [vmem:[%s4610_s21 + $0x74] sm:$0x1 pattern:$0x75316420] }
  0x47   : > { %v1467_v15 = vcombine.low %v1458_v3, %v1465_v5  ;;  %v933_v16 = vrot.slane %v919_v8, %v4605_v6  ;;  %v934_v17 = vcombine.high %v926_v9, %v926_v9  ;;  %v1484_v18 = vcombine.low %v911_v7, %v926_v9 }
  0x48   : > { %v1433_v20 = vcombine.low %v1425_v1, %v1432_v11  ;;  %v1474_v21 = vrot.slane %v1466_v12, %v4605_v6  ;;  %v1493_v22 = vrot.slane %v1483_v14, %v4605_v6  ;;  %v957_v23 = vcombine.high %v4165_v10, %v4165_v10 }
  0x49   : > { %v1481_v24 = vrot.slane %v1467_v15, %v4605_v6  ;;  %v935_v25 = vcombine.high %v933_v16, %v933_v16  ;;  %v1485_v26 = vcombine.low %v933_v16, %v934_v17  ;;  %v1500_v27 = vrot.slane %v1484_v18, %v4605_v6 }
  0x4a   : > { %4300 = vmatprep.mubr.msk.bf16.mxu0 %vm1706_vm0, %v1433_v20  ;;  %v964_v29 = vrot.slane %v4165_v10, %v4605_v6  ;;  %v971_v30 = vrot.slane %v957_v23, %v4605_v6  ;;  %v981_v31 = vcombine.high %v4166_v19, %v4166_v19  ;;  %v988_v32 = vrot.slane %v4166_v19, %v4605_v6 }
  0x4b   : > { %v1482_v34 = vcombine.low %v1474_v21, %v1481_v24  ;;  %v1486_v35 = vcombine.low %v935_v25, %v949_v13  ;;  %v1507_v36 = vrot.slane %v1485_v26, %v4605_v6  ;;  %v1515_v37 = vcombine.low %v1493_v22, %v1500_v27 }
  0x4c   : > { %v995_v38 = vrot.slane %v981_v31, %v4605_v6  ;;  %v1532_v39 = vcombine.low %v964_v29, %v971_v30  ;;  %v4179_v40 = vcombine.high %v964_v29, %v971_v30  ;;  %v1011_v42 = vrot.slane %v4167_v28, %v4605_v6  ;;  %v4140_v28 = vld [vmem:[%s5645_s3] ss:$0 sm:$0xff] }
  0x4d   : > { %4301 = vmatmul.mubr.msk.bf16.gmra.mrb[12].mxu0 %vm1706_vm0, %v1482_v34  ;;  %v1514_v43 = vrot.slane %v1486_v35, %v4605_v6  ;;  %v1523_v44 = vrot.slane %v1515_v37, %v4605_v6  ;;  %v1019_v45 = vcombine.high %v4168_v33, %v4168_v33  ;;  %v1026_v46 = vrot.slane %v4168_v33, %v4605_v6 }
  0x4e   : > { %v1534_v47 = vcombine.low %v988_v32, %v995_v38  ;;  %v4180_v48 = vcombine.high %v988_v32, %v995_v38  ;;  %v1542_v49 = vrot.slane %v1532_v39, %v4605_v6  ;;  %v1549_v50 = vrot.slane %v4179_v40, %v4605_v6 }
  0x4f   : > { %v1516_v51 = vcombine.low %v1507_v36, %v1514_v43  ;;  %v1033_v52 = vrot.slane %v1019_v45, %v4605_v6  ;;  %v1034_v53 = vcombine.high %v1026_v46, %v1026_v46  ;;  %v1043_v54 = vcombine.high %v4169_v41, %v4169_v41 }
  0x50   : > { %v1556_v55 = vrot.slane %v1534_v47, %v4605_v6  ;;  %v1563_v56 = vrot.slane %v4180_v48, %v4605_v6  ;;  %v1564_v57 = vcombine.low %v1542_v49, %v1549_v50  ;;  %v1050_v58 = vrot.slane %v4169_v41, %v4605_v6 }
  0x51   : > { %v1530_v59 = vrot.slane %v1516_v51, %v4605_v6  ;;  %v1035_v60 = vcombine.high %v1033_v52, %v1033_v52  ;;  %v1057_v61 = vrot.slane %v1043_v54, %v4605_v6  ;;  %v1581_v62 = vcombine.low %v1011_v42, %v1026_v46 }
  0x52   : > { %v1565_v0 = vcombine.low %v1556_v55, %v1563_v56  ;;  %v1572_v1 = vrot.slane %v1564_v57, %v4605_v6  ;;  %v1058_v2 = vcombine.high %v1050_v58, %v1050_v58  ;;  %v1582_v3 = vcombine.low %v1033_v52, %v1034_v53 }
  0x53   : > { %v1531_v5 = vcombine.low %v1523_v44, %v1530_v59  ;;  %v1583_v7 = vcombine.low %v1035_v60, %v1050_v58  ;;  %v1591_v8 = vrot.slane %v1581_v62, %v4605_v6  ;;  %v1059_v9 = vcombine.high %v1057_v61, %v1057_v61 }
  0x54   : > { %v1579_v10 = vrot.slane %v1565_v0, %v4605_v6  ;;  %v1584_v11 = vcombine.low %v1057_v61, %v1058_v2  ;;  %v1598_v12 = vrot.slane %v1582_v3, %v4605_v6  ;;  %v1073_v13 = vrot.slane %v4170_v63, %v4605_v6 }
  0x55   : > { %4304 = vmatprep.mubr.msk.bf16.mxu0 %vm1706_vm0, %v1531_v5  ;;  %v1605_v14 = vrot.slane %v1583_v7, %v4605_v6  ;;  %v4514_v25 = vmov 1983009808   ;;  %v1074_v30 = vcombine.high %v4140_v28, %v4140_v28  ;;  %v4799_v50 = vstv %s4792_s24  ;;  %s5712_s24 = smov (!%p365_p7, %s4792_s24), 15 }
  0x56   : > { %v1580_v15 = vcombine.low %v1572_v1, %v1579_v10  ;;  %v1612_v16 = vrot.slane %v1584_v11, %v4605_v6  ;;  %v1613_v17 = vcombine.low %v1591_v8, %v1598_v12  ;;  %v1630_v18 = vcombine.low %v1059_v9, %v1073_v13  ;;  %5652 = vst [vmem:[#allocation2_spill] sm:$0xff] %v4799_v50  ;;  %s4132_s21 = sshll.u32 %s5712_s24, 1 }
  0x57   : > { %v1076_v26 = vunpack.c.l.s4 %v4514_v25  ;;  %v4802_v51 = vadd.s32 16, %v4601_v4  ;;  %vm2470_vm1 = vcmp.ge.s32.totalorder %v4799_v50, 1  ;;  %vm2480_vm2 = vcmp.lt.s32.totalorder %v4799_v50, 17  ;;  %s369_s23 = sadd.s32 %s4133_s22, %s4132_s21 }
  0x58   : > { %4305 = vmatmul.mubr.msk.bf16.gmra.mrb[16].mxu0 %vm1706_vm0, %v1580_v15  ;;  %v1614_v19 = vcombine.low %v1605_v14, %v1612_v16  ;;  %v1621_v20 = vrot.slane %v1613_v17, %v4605_v6  ;;  %v1637_v21 = vrot.slane %v1630_v18, %v4605_v6  ;;  %v4822_v3 = vadd.s32 3, %v4799_v50  ;;  %vm4855_vm5 = vmand %vm2470_vm1, %vm2480_vm2 }
  0x59   : > { %v1077_v27 = vunpack.c.0.s8 %v1076_v26  ;;  %v4827_v9 = vadd.s32 4, %v4799_v50  ;;  %vm2535_vm3 = vcmp.lt.s32.totalorder %v4802_v51, 17  ;;  %vm4876_vm7 = vmand %vm4855_vm5, %vm2500_vm4  ;;  %vm3307_vm2 = vcmask 1046528  }
  0x5a   : > { %v1628_v22 = vrot.slane %v1614_v19, %v4605_v6  ;;  %v1644_v24 = vrot.slane %v1637_v21, %v4605_v6  ;;  %v4834_v21 = vadd.s32 8, %v4799_v50  ;;  %vm2538_vm6 = vmand %vm4855_vm5, %vm2535_vm3  ;;  %vm2473_vm8 = vcmp.ge.s32.totalorder %v4822_v3, 1 }
  0x5b   : > { %v4776_v29 = vsub.s32 %v1077_v27, %v4601_v4  ;;  %vm2483_vm9 = vcmp.lt.s32.totalorder %v4822_v3, 17  ;;  %vm2474_vm11 = vcmp.ge.s32.totalorder %v4827_v9, 1  ;;  %vm2484_vm12 = vcmp.lt.s32.totalorder %v4827_v9, 17  ;;  %v4471_v4 = vld [vmem:[%s5646_s4] sm:$0x3f]  }
  0x5c   : > { %v1629_v23 = vcombine.low %v1621_v20, %v1628_v22  ;;  %vm5043_vm10 = vmand %vm2473_vm8, %vm2483_vm9  ;;  %vm2478_vm13 = vcmp.ge.s32.totalorder %v4834_v21, 1  ;;  %vm2488_vm14 = vcmp.lt.s32.totalorder %v4834_v21, 17 }
  0x5d   : > { %v1081_v31 = vrot.slane %v4140_v28, %v4776_v29  ;;  %v1088_v6 = vrot.slane %v1074_v30, %v4776_v29  ;;  %v4837_v28 = vadd.s32 5, %v4799_v50  ;;  %v4840_v30 = vadd.s32 6, %v4799_v50  ;;  %vm5066_vm15 = vmand %vm5043_vm10, %vm2500_vm4 }
  0x5e   : > { %4308 = vmatprep.mubr.msk.bf16.mxu0 %vm1706_vm0, %v1629_v23  ;;  %vm2547_vm1 = vmand %vm5043_vm10, %vm2535_vm3 }
  0x5f   : > { %v1089_v32 = vcombine.high %v1081_v31, %v1081_v31  ;;  %v1090_v33 = vcombine.high %v1088_v6, %v1088_v6  ;;  %v1668_v34 = vcombine.low %v1081_v31, %v1081_v31  ;;  %vm5118_vm8 = vmand %vm2478_vm13, %vm2488_vm14  ;;  %vm3146_vm14 = vsmask.f32 7424 }
  0x60   : > { %4309 = vmatmul.mubr.msk.bf16.gmra.mrb[20].mxu0 %vm1706_vm0, %v1644_v24  ;;  %vm5156_vm13 = vmand %vm5118_vm8, %vm2500_vm4 }
  0x61   : > { %v1669_v35 = vcombine.low %v1089_v32, %v1088_v6  ;;  %v1651_v36 = vcombine.low %v1081_v31, %v1089_v32  ;;  %v1652_v37 = vcombine.low %v1088_v6, %v1090_v33  ;;  %v1685_v38 = vcombine.low %v1090_v33, %v1081_v31 }
  0x62   : > { %v1676_v39 = vrot.slane %v1668_v34, %v4776_v29 }
  0x63   : > { %v1683_v40 = vrot.slane %v1669_v35, %v4776_v29  ;;  %v1659_v41 = vrot.slane %v1651_v36, %v4776_v29  ;;  %v1666_v42 = vrot.slane %v1652_v37, %v4776_v29  ;;  %v4785_v43 = vrot.slane %v1685_v38, %v4776_v29 }
  0x65   : > { %v4787_v44 = vcombine.low %v1676_v39, %v1683_v40  ;;  %v4789_v45 = vcombine.low %v1659_v41, %v1666_v42  ;;  %v4795_v46 = vcombine.low %v4785_v43, %v1683_v40  ;;  %v4805_v54 = vcombine.low %v1666_v42, %v1676_v39 }
  0x66   : > { %v4810_v59 = vcombine.low %v4785_v43, %v1659_v41  ;;  %v4814_v62 = vcombine.low %v1683_v40, %v4785_v43  ;;  %v4816_v63 = vcombine.low %v1666_v42, %v1659_v41 }
 0x101   : > { %v4290_v47 = vpop.f32.mrb[0].mxu0 }
 0x102   : > { %v1786_v48 = vadd.f32 %v4290_v47, %v4787_v44  ;;  %v1777_v49 = vpop.f32.mrb[1].mxu0 }
 0x103   : > { %v1778_v52 = vadd.f32 %v1777_v49, %v4789_v45  ;;  %v4291_v53 = vpop.f32.mrb[2].mxu0 }
 0x104   : > { %v1928_v55 = vcombine.high %v1786_v48, %v1786_v48  ;;  %v1935_v56 = vrot.slane %v1786_v48, %v4776_v29  ;;  %v1789_v57 = vadd.f32 %v4291_v53, %v4795_v46  ;;  %v1780_v58 = vpop.f32.mrb[3].mxu0 }
 0x105   : > { %v1894_v60 = vcombine.high %v1778_v52, %v1778_v52  ;;  %v1901_v61 = vrot.slane %v1778_v52, %v4776_v29  ;;  %v1781_v13 = vadd.f32 %v1780_v58, %v4789_v45 }
 0x106   : > { %v1942_v0 = vrot.slane %v1928_v55, %v4776_v29  ;;  %v1943_v1 = vcombine.high %v1935_v56, %v1935_v56  ;;  %v1945_v2 = vcombine.high %v1789_v57, %v1789_v57  ;;  %v1952_v8 = vrot.slane %v1789_v57, %v4776_v29 }
 0x107   : > { %v1908_v5 = vrot.slane %v1894_v60, %v4776_v29  ;;  %v1909_v7 = vcombine.high %v1901_v61, %v1901_v61  ;;  %v2374_v14 = vmax.f32 %v1935_v56, 0.0  ;;  %v2366_v20 = vmax.f32 %v1901_v61, 0.0 }
 0x108   : > { %v1944_v10 = vcombine.high %v1942_v0, %v1942_v0  ;;  %v2375_v11 = vmax.f32 %v1943_v1, 0.0  ;;  %v2376_v12 = vmax.f32 %v1942_v0, 0.0  ;;  %v1959_v17 = vrot.slane %v1945_v2, %v4776_v29 }
 0x109   : > { %v1910_v15 = vcombine.high %v1908_v5, %v1908_v5  ;;  %v2367_v16 = vmax.f32 %v1909_v7, 0.0  ;;  %v2368_v22 = vmax.f32 %v1908_v5, 0.0  ;;  %v1960_v24 = vcombine.high %v1952_v8, %v1952_v8 }
 0x10a   : > { %v2377_v18 = vmax.f32 %v1944_v10, 0.0  ;;  %v2697_v19 = vcombine.low %v2375_v11, %v2376_v12  ;;  %v2378_v25 = vmax.f32 %v1952_v8, 0.0  ;;  %v1911_v27 = vcombine.high %v1781_v13, %v1781_v13 }
 0x10b   : > { %v2369_v23 = vmax.f32 %v1910_v15, 0.0  ;;  %v2656_v26 = vcombine.low %v2366_v20, %v2367_v16  ;;  %v2696_v31 = vrot.slane %v2374_v14, %v4776_v29  ;;  %v1961_v32 = vcombine.high %v1959_v17, %v1959_v17 }
 0x10c   : > { %v2698_v33 = vcombine.low %v2377_v18, %v2378_v25  ;;  %v2705_v35 = vrot.slane %v2697_v19, %v4776_v29  ;;  %v1918_v36 = vrot.slane %v1781_v13, %v4776_v29  ;;  %v1925_v37 = vrot.slane %v1911_v27, %v4776_v29 }
 0x10d   : > { %v2657_v6 = vcombine.low %v2368_v22, %v2369_v23  ;;  %v4294_v34 = vpop.f32.mrb[4].mxu0  ;;  %v2379_v40 = vmax.f32 %v1960_v24, 0.0  ;;  %v2380_v41 = vmax.f32 %v1959_v17, 0.0  ;;  %v2664_v49 = vrot.slane %v2656_v26, %v4776_v29 }
 0x10e   : > { %v1802_v38 = vadd.f32 %v4294_v34, %v4805_v54  ;;  %v1793_v39 = vpop.f32.mrb[5].mxu0  ;;  %v2712_v42 = vrot.slane %v2698_v33, %v4776_v29  ;;  %v1926_v53 = vcombine.high %v1918_v36, %v1918_v36  ;;  %v1927_v55 = vcombine.high %v1925_v37, %v1925_v37 }
 0x10f   : > { %v1794_v47 = vadd.f32 %v1793_v39, %v4810_v59  ;;  %v4295_v48 = vpop.f32.mrb[6].mxu0  ;;  %v2671_v52 = vrot.slane %v2657_v6, %v4776_v29  ;;  %v2370_v60 = vmax.f32 %v1918_v36, 0.0  ;;  %v2372_v61 = vmax.f32 %v1925_v37, 0.0 }
 0x110   : > { %v1796_v56 = vpop.f32.mrb[7].mxu0  ;;  %v4859_v58 = vcombine.low %v2705_v35, %v2712_v42  ;;  %v1996_v0 = vcombine.high %v1802_v38, %v1802_v38  ;;  %v2371_v1 = vmax.f32 %v1926_v53, 0.0  ;;  %v2373_v2 = vmax.f32 %v1927_v55, 0.0 }
 0x111   : > { %v2003_v5 = vrot.slane %v1802_v38, %v4776_v29  ;;  %v1962_v7 = vcombine.high %v1794_v47, %v1794_v47  ;;  %v2381_v8 = vmax.f32 %v1961_v32, 0.0  ;;  %v2714_v10 = vcombine.low %v2379_v40, %v2380_v41 }
 0x112   : > { %v4863_v11 = vrot.slane %v1996_v0, %v4776_v29  ;;  %v4866_v12 = vrot.slane %v1794_v47, %v4776_v29  ;;  %v2672_v13 = vcombine.low %v2664_v49, %v2671_v52  ;;  %v2673_v14 = vcombine.low %v2370_v60, %v2371_v1 }
 0x113   : > { %v2674_v15 = vcombine.low %v2372_v61, %v2373_v2  ;;  %v2011_v16 = vcombine.high %v2003_v5, %v2003_v5  ;;  %v2390_v19 = vmax.f32 %v2003_v5, 0.0  ;;  %v1976_v20 = vrot.slane %v1962_v7, %v4776_v29 }
 0x114   : > { %v2012_v18 = vcombine.high %v4863_v11, %v4863_v11  ;;  %v1805_v22 = vadd.f32 %v4295_v48, %v4814_v62  ;;  %v2681_v23 = vrot.slane %v2673_v14, %v4776_v29  ;;  %v2382_v26 = vmax.f32 %v4866_v12, 0.0 }
 0x115   : > { %v2688_v24 = vrot.slane %v2674_v15, %v4776_v29  ;;  %v2391_v25 = vmax.f32 %v2011_v16, 0.0  ;;  %v4887_v6 = vsel %vm2538_vm6, %v2696_v31, 0.0  ;;  %v2722_v32 = vrot.slane %v2714_v10, %v4776_v29 }
 0x116   : > { %v4298_v27 = vpop.f32.mrb[8].mxu0  ;;  %v1978_v33 = vcombine.high %v1976_v20, %v1976_v20  ;;  %v4891_v35 = vadd.s32 7, %v4799_v50  ;;  %v3096_v36 = vsel %vm4876_vm7, %v2672_v13, 0.0  ;;  %v2715_v39 = vcombine.low %v2381_v8, %v2382_v26  ;;  %vm5107_vm7 = vmand %vm2474_vm11, %vm2484_vm12 }
 0x117   : > { %v1809_v34 = vpop.f32.mrb[9].mxu0  ;;  %v2689_v37 = vcombine.low %v2681_v23, %v2688_v24  ;;  %v4895_v38 = vcombine.low %v2390_v19, %v2391_v25  ;;  %v2384_v41 = vmax.f32 %v1976_v20, 0.0  ;;  %v2013_v47 = vcombine.high %v1805_v22, %v1805_v22  ;;  %vm5130_vm9 = vmand %vm5107_vm7, %vm2500_vm4 }
 0x118   : > { %v4299_v40 = vpop.f32.mrb[10].mxu0  ;;  %v2385_v42 = vmax.f32 %v1978_v33, 0.0  ;;  %v2020_v31 = vrot.slane %v1805_v22, %v4776_v29  ;;  %v2393_v52 = vmax.f32 %v2012_v18, 0.0  ;;  %v2729_v53 = vrot.slane %v2715_v39, %v4776_v29 }
 0x119   : > { %v4898_v48 = vpop.f32.mrb[11].mxu0  ;;  %v3097_v49 = vsel %vm4855_vm5, %v2689_v37, 0.0  ;;  %v1797_v55 = vadd.f32 %v1796_v56, %v4816_v63  ;;  %v2027_v0 = vrot.slane %v2013_v47, %v4776_v29  ;;  %v2770_v57 = vrot.slane %v4895_v38, %v4776_v29 }
 0x11a   : > { %v4904_v60 = vpack.c.bf16 %v3097_v49, %v3096_v36  ;;  %v2738_v61 = vcombine.low %v2384_v41, %v2385_v42  ;;  %v2028_v1 = vcombine.high %v2020_v31, %v2020_v31  ;;  %v4907_v2 = vcombine.low %v2722_v32, %v2729_v53 }
 0x11b   : > { %v2394_v5 = vmax.f32 %v2020_v31, 0.0  ;;  %v1979_v7 = vcombine.high %v1797_v55, %v1797_v55  ;;  %v1986_v8 = vrot.slane %v1797_v55, %v4776_v29  ;;  %v1977_v10 = vcombine.high %v4866_v12, %v4866_v12 }
 0x11c   : > { %v2395_v13 = vmax.f32 %v2028_v1, 0.0  ;;  %v2396_v56 = vmax.f32 %v2027_v0, 0.0  ;;  %v2746_v14 = vrot.slane %v2738_v61, %v4776_v29  ;;  %v2029_v18 = vcombine.high %v2027_v0, %v2027_v0 }
 0x11d   : > { %v2779_v15 = vcombine.low %v2393_v52, %v2394_v5  ;;  %v1993_v16 = vrot.slane %v1979_v7, %v4776_v29  ;;  %v1994_v17 = vcombine.high %v1986_v8, %v1986_v8  ;;  %v1818_v20 = vadd.f32 %v4298_v27, %v4789_v45 }
 0x11e   : > { %v2780_v19 = vcombine.low %v2395_v13, %v2396_v56  ;;  %v1810_v22 = vadd.f32 %v1809_v34, %v4814_v62  ;;  %v2386_v25 = vmax.f32 %v1986_v8, 0.0  ;;  %v1821_v53 = vadd.f32 %v4299_v40, %v4787_v44 }
 0x11f   : > { %v2787_v23 = vrot.slane %v2779_v15, %v4776_v29  ;;  %v1995_v24 = vcombine.high %v1993_v16, %v1993_v16  ;;  %v2387_v26 = vmax.f32 %v1994_v17, 0.0  ;;  %v2064_v36 = vcombine.high %v1818_v20, %v1818_v20 }
 0x120   : > { %v4302_v32 = vpop.f32.mrb[12].mxu0  ;;  %v2794_v33 = vrot.slane %v2780_v19, %v4776_v29  ;;  %v2071_v37 = vrot.slane %v1818_v20, %v4776_v29  ;;  %v2030_v38 = vcombine.high %v1810_v22, %v1810_v22  ;;  %v2388_v41 = vmax.f32 %v1993_v16, 0.0 }
 0x121   : > { %v1825_v39 = vpop.f32.mrb[13].mxu0  ;;  %v2389_v42 = vmax.f32 %v1995_v24, 0.0  ;;  %v2739_v47 = vcombine.low %v2386_v25, %v2387_v26  ;;  %v2037_v27 = vrot.slane %v1810_v22, %v4776_v29  ;;  %v2078_v49 = vrot.slane %v2064_v36, %v4776_v29 }
 0x122   : > { %v4922_v31 = vpop.f32.mrb[14].mxu0  ;;  %v4924_v34 = vcombine.low %v2787_v23, %v2794_v33  ;;  %v2079_v52 = vcombine.high %v2071_v37, %v2071_v37  ;;  %v2044_v1 = vrot.slane %v2030_v38, %v4776_v29  ;;  %v2397_v7 = vmax.f32 %v2029_v18, 0.0 }
 0x123   : > { %v4928_v55 = vpop.f32.mrb[15].mxu0  ;;  %v2753_v61 = vrot.slane %v2739_v47, %v4776_v29  ;;  %v2755_v0 = vcombine.low %v2388_v41, %v2389_v42  ;;  %v2045_v5 = vcombine.high %v2037_v27, %v2037_v27  ;;  %v2080_v8 = vcombine.high %v2078_v49, %v2078_v49 }
 0x124   : > { %v2406_v13 = vmax.f32 %v2071_v37, 0.0  ;;  %v2398_v56 = vmax.f32 %v2037_v27, 0.0  ;;  %v2407_v17 = vmax.f32 %v2079_v52, 0.0  ;;  %v2408_v20 = vmax.f32 %v2078_v49, 0.0 }
 0x125   : > { %v4932_v15 = vcombine.low %v2746_v14, %v2753_v61  ;;  %v2763_v16 = vrot.slane %v2755_v0, %v4776_v29  ;;  %v2399_v19 = vmax.f32 %v2045_v5, 0.0  ;;  %v2409_v40 = vmax.f32 %v2080_v8, 0.0 }
 0x126   : > { %v2400_v22 = vmax.f32 %v2044_v1, 0.0  ;;  %v2796_v23 = vcombine.low %v2397_v7, %v2398_v56  ;;  %v2046_v25 = vcombine.high %v2044_v1, %v2044_v1  ;;  %v2081_v26 = vcombine.high %v1821_v53, %v1821_v53 }
 0x127   : > { %5657 = vst [vmem:[#allocation3_spill] sm:$0xff] %v4932_v15  ;;  %v4935_v24 = vcombine.low %v2763_v16, %v2770_v57  ;;  %v2088_v33 = vrot.slane %v1821_v53, %v4776_v29  ;;  %v4940_v36 = vpack.c.bf16 %v4887_v6, %v4887_v6  ;;  %v4943_v14 = vadd.s32 1, %v4799_v50 }
 0x128   : > { %v2797_v18 = vcombine.low %v2399_v19, %v2400_v22  ;;  %v4946_v37 = vadd.s32 2, %v4799_v50  ;;  %v2837_v38 = vcombine.low %v2406_v13, %v2407_v17  ;;  %v2838_v41 = vcombine.low %v2408_v20, %v2409_v40 }
 0x129   : > { %5658 = vst [vmem:[#allocation4_spill] sm:$0xff] %v4935_v24  ;;  %v2095_v57 = vrot.slane %v2081_v26, %v4776_v29  ;;  %v2096_v42 = vcombine.high %v2088_v33, %v2088_v33  ;;  %v2804_v47 = vrot.slane %v2796_v23, %v4776_v29  ;;  %v1813_v49 = vadd.f32 %v4898_v48, %v4789_v45 }
 0x12a   : > { %v2811_v27 = vrot.slane %v2797_v18, %v4776_v29  ;;  %v1834_v6 = vadd.f32 %v4302_v32, %v4816_v63  ;;  %v4959_v53 = vmax.f32 %v1977_v10, 0.0  ;;  %v4961_v61 = vmax.f32 %v2046_v25, 0.0 }
 0x12b   : > { %v4954_v52 = vpop.f32.mrb[16].mxu0  ;;  %v2410_v0 = vmax.f32 %v2088_v33, 0.0  ;;  %v2411_v1 = vmax.f32 %v2096_v42, 0.0  ;;  %v2412_v8 = vmax.f32 %v2095_v57, 0.0  ;;  %v2047_v13 = vcombine.high %v1813_v49, %v1813_v49 }
 0x12c   : > { %v4963_v5 = vpop.f32.mrb[17].mxu0  ;;  %v4965_v7 = vcombine.low %v2804_v47, %v2811_v27  ;;  %v2054_v48 = vrot.slane %v1813_v49, %v4776_v29  ;;  %v2845_v32 = vrot.slane %v2837_v38, %v4776_v29  ;;  %v2852_v12 = vrot.slane %v2838_v41, %v4776_v29 }
 0x12d   : > { %v4968_v63 = vpop.f32.mrb[18].mxu0  ;;  %v2132_v10 = vcombine.high %v1834_v6, %v1834_v6  ;;  %v2139_v56 = vrot.slane %v1834_v6, %v4776_v29  ;;  %v2097_v17 = vcombine.high %v2095_v57, %v2095_v57  ;;  %v2061_v19 = vrot.slane %v2047_v13, %v4776_v29 }
 0x12e   : > { %v4973_v16 = vpop.f32.mrb[19].mxu0  ;;  %v2062_v20 = vcombine.high %v2054_v48, %v2054_v48  ;;  %v1826_v40 = vadd.f32 %v1825_v39, %v4795_v46  ;;  %v4980_v23 = vrot.slane %v2410_v0, %v4776_v29  ;;  %v2861_v33 = vcombine.low %v2411_v1, %v2412_v8 }
 0x12f   : > { %v2146_v25 = vrot.slane %v2132_v10, %v4776_v29  ;;  %v2147_v26 = vcombine.high %v2139_v56, %v2139_v56  ;;  %v2063_v18 = vcombine.high %v2061_v19, %v2061_v19  ;;  %v4983_v42 = vcombine.low %v2845_v32, %v2852_v12 }
 0x130   : > { %v2403_v38 = vmax.f32 %v2062_v20, 0.0  ;;  %v2098_v41 = vcombine.high %v1826_v40, %v1826_v40  ;;  %v2402_v57 = vmax.f32 %v2054_v48, 0.0  ;;  %v2105_v27 = vrot.slane %v1826_v40, %v4776_v29 }
 0x131   : > { %v2148_v47 = vcombine.high %v2146_v25, %v2146_v25  ;;  %v2413_v39 = vmax.f32 %v2097_v17, 0.0  ;;  %v2423_v49 = vmax.f32 %v2147_v26, 0.0  ;;  %v1837_v0 = vadd.f32 %v4922_v31, %v4805_v54 }
 0x132   : > { %v2112_v6 = vrot.slane %v2098_v41, %v4776_v29  ;;  %v2405_v10 = vmax.f32 %v2063_v18, 0.0  ;;  %v4991_v1 = vcombine.low %v2402_v57, %v2403_v38  ;;  %v2113_v8 = vcombine.high %v2105_v27, %v2105_v27 }
 0x133   : > { %v4989_v13 = vpop.f32.mrb[20].mxu0  ;;  %v2414_v20 = vmax.f32 %v2105_v27, 0.0  ;;  %v2869_v48 = vrot.slane %v2861_v33, %v4776_v29  ;;  %v2422_v12 = vmax.f32 %v2139_v56, 0.0  ;;  %v2425_v40 = vmax.f32 %v2148_v47, 0.0 }
 0x134   : > { %v4993_v32 = vpop.f32.mrb[21].mxu0  ;;  %v2114_v17 = vcombine.high %v2112_v6, %v2112_v6  ;;  %v2404_v22 = vmax.f32 %v2061_v19, 0.0  ;;  %v2415_v41 = vmax.f32 %v2113_v8, 0.0  ;;  %v2416_v24 = vmax.f32 %v2112_v6, 0.0 }
 0x135   : > { %v4311_v26 = vpop.f32.mrb[22].mxu0  ;;  %v2862_v15 = vcombine.low %v2413_v39, %v2414_v20  ;;  %v2424_v31 = vmax.f32 %v2146_v25, 0.0  ;;  %v4998_v18 = vcombine.low %v2422_v12, %v2423_v49  ;;  %v2149_v38 = vcombine.high %v1837_v0, %v1837_v0 }
 0x136   : > { %v4996_v54 = vpop.f32.mrb[23].mxu0  ;;  %v2156_v57 = vrot.slane %v1837_v0, %v4776_v29  ;;  %v2821_v27 = vcombine.low %v2404_v22, %v2405_v10  ;;  %v2828_v33 = vrot.slane %v4991_v1, %v4776_v29  ;;  %v1829_v19 = vadd.f32 %v4928_v55, %v4810_v59 }
 0x137   : > { %v2876_v56 = vrot.slane %v2862_v15, %v4776_v29  ;;  %v2919_v47 = vcombine.low %v2424_v31, %v2425_v40  ;;  %v2417_v25 = vmax.f32 %v2114_v17, 0.0  ;;  %v5009_v39 = vrot.slane %v2149_v38, %v4776_v29 }
 0x138   : > { %v2164_v49 = vcombine.high %v2156_v57, %v2156_v57  ;;  %v2878_v22 = vcombine.low %v2415_v41, %v2416_v24  ;;  %v2115_v0 = vcombine.high %v1829_v19, %v1829_v19  ;;  %v5014_v10 = vrot.slane %v1829_v19, %v4776_v29 }
 0x139   : > { %v5011_v6 = vcombine.low %v2869_v48, %v2876_v56  ;;  %v2165_v59 = vcombine.high %v5009_v39, %v5009_v39  ;;  %v2426_v55 = vmax.f32 %v2156_v57, 0.0  ;;  %v1850_v1 = vadd.f32 %v4954_v52, %v4789_v45 }
 0x13a   : > { %v2427_v15 = vmax.f32 %v2164_v49, 0.0  ;;  %v2917_v8 = vrot.slane %v4998_v18, %v4776_v29  ;;  %v2129_v20 = vrot.slane %v2115_v0, %v4776_v29  ;;  %v2418_v48 = vmax.f32 %v5014_v10, 0.0 }
 0x13b   : > { %v1842_v24 = vadd.f32 %v4963_v5, %v4814_v62  ;;  %v2835_v12 = vrot.slane %v2821_v27, %v4776_v29  ;;  %v2927_v40 = vrot.slane %v2919_v47, %v4776_v29  ;;  %v2200_v26 = vcombine.high %v1850_v1, %v1850_v1 }
 0x13c   : > { %v2920_v17 = vcombine.low %v2426_v55, %v2427_v15  ;;  %v2886_v41 = vrot.slane %v2878_v22, %v4776_v29  ;;  %v2429_v31 = vmax.f32 %v2165_v59, 0.0  ;;  %v2131_v52 = vcombine.high %v2129_v20, %v2129_v20 }
 0x13d   : > { %v2879_v38 = vcombine.low %v2417_v25, %v2418_v48  ;;  %v2207_v57 = vrot.slane %v1850_v1, %v4776_v29  ;;  %v2214_v56 = vrot.slane %v2200_v26, %v4776_v29  ;;  %v2166_v19 = vcombine.high %v1842_v24, %v1842_v24 }
 0x13e   : > { %v2934_v18 = vrot.slane %v2920_v17, %v4776_v29  ;;  %v2420_v49 = vmax.f32 %v2129_v20, 0.0  ;;  %v2421_v5 = vmax.f32 %v2131_v52, 0.0  ;;  %v2173_v47 = vrot.slane %v1842_v24, %v4776_v29 }
 0x13f   : > { %v2893_v27 = vrot.slane %v2879_v38, %v4776_v29  ;;  %v2215_v55 = vcombine.high %v2207_v57, %v2207_v57  ;;  %v2216_v22 = vcombine.high %v2214_v56, %v2214_v56  ;;  %v2438_v59 = vmax.f32 %v2207_v57, 0.0 }
 0x140   : > { %v5034_v0 = vcombine.low %v2927_v40, %v2934_v18  ;;  %v2902_v25 = vcombine.low %v2420_v49, %v2421_v5  ;;  %v2440_v48 = vmax.f32 %v2214_v56, 0.0  ;;  %v2180_v1 = vrot.slane %v2166_v19, %v4776_v29 }
 0x141   : > { %v5036_v15 = vcombine.low %v2886_v41, %v2893_v27  ;;  %v2439_v17 = vmax.f32 %v2215_v55, 0.0  ;;  %v2441_v26 = vmax.f32 %v2216_v22, 0.0  ;;  %v2181_v50 = vcombine.high %v2173_v47, %v2173_v47 }
 0x142   : > { %v2430_v20 = vmax.f32 %v2173_v47, 0.0  ;;  %v2910_v40 = vrot.slane %v2902_v25, %v4776_v29  ;;  %v2182_v41 = vcombine.high %v2180_v1, %v2180_v1  ;;  %v2432_v52 = vmax.f32 %v2180_v1, 0.0 }
 0x143   : > { %v1853_v38 = vadd.f32 %v4968_v63, %v4789_v45  ;;  %v5054_v3 = vcombine.low %v2828_v33, %v2835_v12  ;;  %v2428_v18 = vmax.f32 %v5009_v39, 0.0  ;;  %v2431_v57 = vmax.f32 %v2181_v50, 0.0 }
 0x144   : > { %v2943_v56 = vcombine.low %v2429_v31, %v2430_v20  ;;  %v2130_v19 = vcombine.high %v5014_v10, %v5014_v10  ;;  %v5059_v49 = vcombine.low %v2910_v40, %v2917_v8  ;;  %v2984_v63 = vcombine.low %v2438_v59, %v2439_v17 }
 0x145   : > { %v2217_v5 = vcombine.high %v1853_v38, %v1853_v38  ;;  %v2224_v27 = vrot.slane %v1853_v38, %v4776_v29  ;;  %v2985_v33 = vcombine.low %v2440_v48, %v2441_v26  ;;  %v2433_v50 = vmax.f32 %v2182_v41, 0.0 }
 0x146   : > { %v2944_v39 = vcombine.low %v2431_v57, %v2432_v52  ;;  %v2951_v12 = vrot.slane %v2943_v56, %v4776_v29  ;;  %v1845_v31 = vadd.f32 %v4973_v16, %v4814_v62  ;;  %v3105_v22 = vsel %vm5066_vm15, %v4924_v34, 0.0 }
 0x147   : > { %v2231_v10 = vrot.slane %v2217_v5, %v4776_v29  ;;  %v2232_v8 = vcombine.high %v2224_v27, %v2224_v27  ;;  %v2442_v55 = vmax.f32 %v2224_v27, 0.0  ;;  %v3106_v59 = vsel %vm5043_vm10, %v4965_v7, 0.0  ;;  %vm5140_vm10 = vmand %vm5107_vm7, %vm2535_vm3 }
 0x148   : > { %v2958_v47 = vrot.slane %v2944_v39, %v4776_v29  ;;  %v2183_v16 = vcombine.high %v1845_v31, %v1845_v31  ;;  %v2190_v17 = vrot.slane %v1845_v31, %v4776_v29  ;;  %v5663_v26 = vrot.slane %v4961_v61, %v4776_v29 }
 0x149   : > { %v2233_v25 = vcombine.high %v2231_v10, %v2231_v10  ;;  %v2443_v48 = vmax.f32 %v2232_v8, 0.0  ;;  %v2444_v62 = vmax.f32 %v2231_v10, 0.0  ;;  %v5091_v40 = vpack.c.bf16 %v3106_v59, %v3105_v22 }
 0x14a   : > { %v5085_v1 = vcombine.low %v2951_v12, %v2958_v47  ;;  %v3107_v20 = vsel %vm2547_vm1, %v5663_v26, 0.0  ;;  %vm2475_vm5 = vcmp.ge.s32.totalorder %v4837_v28, 1  ;;  %vm2485_vm6 = vcmp.lt.s32.totalorder %v4837_v28, 17 }
 0x14b   : > { %v2445_v34 = vmax.f32 %v2233_v25, 0.0  ;;  %v3001_v7 = vcombine.low %v2442_v55, %v2443_v48  ;;  %v2197_v24 = vrot.slane %v2183_v16, %v4776_v29  ;;  %v5096_v41 = vpack.c.bf16 %v3107_v20, %v3107_v20  ;;  %vm5195_vm15 = vmand %vm2475_vm5, %vm2485_vm6 }
 0x14c   : > { %v2999_v52 = vrot.slane %v2985_v33, %v4776_v29  ;;  %v2198_v38 = vcombine.high %v2190_v17, %v2190_v17  ;;  %v2434_v57 = vmax.f32 %v2190_v17, 0.0  ;;  %v3317_v56 = vrot.slane %v5091_v40, 1  ;;  %vm5213_vm5 = vmand %vm5195_vm15, %vm2500_vm4 }
 0x14d   : > { %v5100_v61 = vmax.f32 %v2130_v19, 0.0  ;;  %v2992_v5 = vrot.slane %v2984_v63, %v4776_v29  ;;  %v3002_v27 = vcombine.low %v2444_v62, %v2445_v34  ;;  %v2436_v45 = vmax.f32 %v2197_v24, 0.0  ;;  %vm2553_vm6 = vmand %vm5195_vm15, %vm2535_vm3 }
 0x14e   : > { %v2435_v12 = vmax.f32 %v2198_v38, 0.0  ;;  %v2960_v33 = vcombine.low %v2433_v50, %v2434_v57  ;;  %v3318_v10 = vrot.slane %v5096_v41, 1  ;;  %v1866_v19 = vadd.f32 %v4989_v13, %v4785_v43 }
 0x14f   : > { %v3009_v9 = vrot.slane %v3001_v7, %v4776_v29  ;;  %v3016_v8 = vrot.slane %v3002_v27, %v4776_v29  ;;  %v2199_v31 = vcombine.high %v2197_v24, %v2197_v24  ;;  %v1858_v50 = vadd.f32 %v4993_v32, %v4787_v44 }
 0x150   : > { %v3000_v21 = vcombine.low %v2992_v5, %v2999_v52  ;;  %v2961_v13 = vcombine.low %v2435_v12, %v2436_v45  ;;  %v2968_v47 = vrot.slane %v2960_v33, %v4776_v29  ;;  %v3319_v55 = vsel %vm3307_vm2, %v3317_v56, %v3318_v10 }
 0x151   : > { %vm2476_vm11 = vcmp.ge.s32.totalorder %v4840_v30, 1  ;;  %vm2486_vm12 = vcmp.lt.s32.totalorder %v4840_v30, 17  ;;  %v5147_v32 = vrot.slane %v2428_v18, %v4776_v29  ;;  %v2901_v22 = vrot.slane %v5100_v61, %v4776_v29  ;;  %3344 = vrot.lane.b32.xlu1 %v3319_v55, %s4515_s25 }
 0x152   : > { %v3017_v59 = vcombine.low %v3009_v9, %v3016_v8  ;;  %v2234_v25 = vcombine.high %v1858_v50, %v1858_v50  ;;  %v2975_v62 = vrot.slane %v2961_v13, %v4776_v29  ;;  %v5162_v18 = vrot.slane %v1866_v19, %v4776_v29 }
 0x153   : > { %v5165_v16 = vrot.slane %v1858_v50, %v4776_v29  ;;  %v3108_v17 = vsel %vm5130_vm9, %v5054_v3, 0.0  ;;  %v5170_v26 = vmax.f32 %v2199_v31, 0.0  ;;  %v3110_v7 = vsel %vm5140_vm10, %v4980_v23, 0.0  ;;  %vm5234_vm9 = vmand %vm2476_vm11, %vm2486_vm12 }
 0x154   : > { %v2248_v20 = vrot.slane %v2234_v25, %v4776_v29  ;;  %v3121_v34 = vsel %vm5118_vm8, %v3017_v59, 0.0  ;;  %v5178_v24 = vcombine.low %v2968_v47, %v2975_v62  ;;  %v3120_v38 = vsel %vm5156_vm13, %v3000_v21, 0.0  ;;  %vm5246_vm10 = vmand %vm5234_vm9, %vm2500_vm4 }
 0x155   : > { %v2249_v52 = vcombine.high %v5165_v16, %v5165_v16  ;;  %v3109_v3 = vsel %vm5107_vm7, %v4983_v42, 0.0  ;;  %v5187_v61 = vpack.c.bf16 %v3121_v34, %v3120_v38  ;;  %v2454_v27 = vmax.f32 %v5162_v18, 0.0  ;;  %vm2556_vm13 = vmand %vm5234_vm9, %vm2535_vm3 }
 0x156   : > { %v2250_v57 = vcombine.high %v2248_v20, %v2248_v20  ;;  %v2448_v56 = vmax.f32 %v2248_v20, 0.0  ;;  %v5189_v5 = vpack.c.bf16 %v3109_v3, %v3108_v17  ;;  %v2446_v45 = vmax.f32 %v5165_v16, 0.0 }
 0x157   : > { %v2447_v42 = vmax.f32 %v2249_v52, 0.0  ;;  %v3135_v39 = vpack.c.bf16 %v3110_v7, %v3110_v7  ;;  %vm2477_vm1 = vcmp.ge.s32.totalorder %v4891_v35, 1  ;;  %vm2487_vm7 = vcmp.lt.s32.totalorder %v4891_v35, 17 }
 0x158   : > { %v3320_v12 = vrot.slane %v5189_v5, 1  ;;  %v3184_v33 = vshrl.u32 %v5091_v40, 16  ;;  %v3186_v28 = vshll.u32 %v5091_v40, 16  ;;  %v3191_v10 = vshll.u32 %v5096_v41, 16 }
 0x159   : > { %v2449_v19 = vmax.f32 %v2250_v57, 0.0  ;;  %v3025_v9 = vcombine.low %v2447_v42, %v2448_v56  ;;  %v3321_v8 = vrot.slane %v3135_v39, 1  ;;  %v1861_v31 = vadd.f32 %v4996_v54, %v4795_v46 }
 0x15a   : > { %v3188_v43 = vrot.slane %v3186_v28, 1  ;;  %v3193_v21 = vrot.slane %v3191_v10, 1  ;;  %v3196_v13 = vshrl.u32 %v5189_v5, 16  ;;  %v3198_v41 = vshll.u32 %v5189_v5, 16 }
 0x15b   : > { %v3033_v47 = vrot.slane %v3025_v9, %v4776_v29  ;;  %v3322_v55 = vsel %vm3307_vm2, %v3320_v12, %v3321_v8  ;;  %v2251_v44 = vcombine.high %v1861_v31, %v1861_v31  ;;  %v2258_v46 = vrot.slane %v1861_v31, %v4776_v29 }
 0x15c   : > { %3346 = vrot.lane.b32.xlu1 %v3322_v55, %s4515_s25  ;;  %v3189_v54 = vor.u32 %v3188_v43, %v3184_v33  ;;  %v3200_v59 = vrot.slane %v3198_v41, 1  ;;  %v3203_v25 = vshll.u32 %v3135_v39, 16  ;;  %v3111_v48 = vsel %vm5213_vm5, %v5011_v6, 0.0  ;;  %vm5283_vm5 = vmand %vm5118_vm8, %vm2535_vm3 }
 0x15d   : > { %v2265_v16 = vrot.slane %v2251_v44, %v4776_v29  ;;  %v2266_v17 = vcombine.high %v2258_v46, %v2258_v46  ;;  %v2450_v20 = vmax.f32 %v2258_v46, 0.0  ;;  %v3112_v34 = vsel %vm5195_vm15, %v5036_v15, 0.0  ;;  %vm5275_vm15 = vmand %vm2477_vm1, %vm2487_vm7 }
 0x15e   : > { %v3194_v30 = vsel %vm3146_vm14, %v3189_v54, %v3193_v21  ;;  %v3201_v7 = vor.u32 %v3200_v59, %v3196_v13  ;;  %v3205_v52 = vrot.slane %v3203_v25, 1  ;;  %v3113_v38 = vsel %vm2553_vm6, %v2901_v22, 0.0  ;;  %vm5309_vm7 = vmand %vm5275_vm15, %vm2500_vm4 }
 0x15f   : > { %vm2471_vm11 = vcmp.ge.s32.totalorder %v4943_v14, 1  ;;  %vm2481_vm12 = vcmp.lt.s32.totalorder %v4943_v14, 17  ;;  %3273 = vrot.lane.b32.xlu0 %v3194_v30, %s4516_s26  ;;  %v2267_v15 = vcombine.high %v2265_v16, %v2265_v16  ;;  %v2451_v3 = vmax.f32 %v2266_v17, 0.0  ;;  %vm2559_vm6 = vmand %vm5275_vm15, %vm2535_vm3 }
 0x160   : > { %v2452_v57 = vmax.f32 %v2265_v16, 0.0  ;;  %v3026_v56 = vcombine.low %v2449_v19, %v2450_v20  ;;  %v3206_v23 = vsel %vm3146_vm14, %v3201_v7, %v3205_v52  ;;  %v5259_v42 = vpack.c.bf16 %v3112_v34, %v3111_v48 }
 0x161   : > { %v3137_v22 = vpack.c.bf16 %v3113_v38, %v3113_v38  ;;  %v3114_v39 = vsel %vm5246_vm10, %v5059_v49, 0.0  ;;  %v3024_v12 = vrot.slane %v2446_v45, %v4776_v29  ;;  %v2453_v33 = vmax.f32 %v2267_v15, 0.0 }
 0x162   : > { %v3040_v28 = vrot.slane %v3026_v56, %v4776_v29  ;;  %v3042_v10 = vcombine.low %v2451_v3, %v2452_v57  ;;  %v3210_v19 = vshll.u32 %v5259_v42, 16  ;;  %v3115_v8 = vsel %vm5234_vm9, %v5034_v0, 0.0  ;;  %vm5339_vm9 = vmand %vm2471_vm11, %vm2481_vm12 }
 0x163   : > { %v3215_v9 = vshll.u32 %v3137_v22, 16  ;;  %v3116_v31 = vsel %vm2556_vm13, %v5147_v32, 0.0  ;;  %v3043_v0 = vcombine.low %v2453_v33, %v2454_v27  ;;  %3275 = vrot.lane.b32.xlu0 %v3206_v23, %s4516_s26  ;;  %v5293_v35 = vpack.c.bf16 %v3115_v8, %v3114_v39  ;;  %vm5355_vm10 = vmand %vm5339_vm9, %vm2500_vm4 }
 0x164   : > { %v5287_v50 = vcombine.low %v3033_v47, %v3040_v28  ;;  %v3050_v32 = vrot.slane %v3042_v10, %v4776_v29  ;;  %v2392_v43 = vmax.f32 %v4863_v11, 0.0  ;;  %v3208_v21 = vshrl.u32 %v5259_v42, 16  ;;  %vm2541_vm11 = vmand %vm5339_vm9, %vm2535_vm3 }
 0x165   : > { %v3212_v63 = vrot.slane %v3210_v19, 1  ;;  %v3139_v13 = vpack.c.bf16 %v3116_v31, %v3116_v31  ;;  %vm2472_vm8 = vcmp.ge.s32.totalorder %v4946_v37, 1  ;;  %vm2482_vm1 = vcmp.lt.s32.totalorder %v4946_v37, 17 }
 0x166   : > { %v2737_v41 = vrot.slane %v4959_v53, %v4776_v29  ;;  %v2983_v27 = vrot.slane %v5170_v26, %v4776_v29  ;;  %v3057_v47 = vrot.slane %v3043_v0, %v4776_v29  ;;  %v3222_v55 = vshll.u32 %v5293_v35, 16  ;;  %vm5375_vm12 = vmand %vm2472_vm8, %vm2482_vm1 }
 0x167   : > { %v3122_v44 = vsel %vm5283_vm5, %v3024_v12, 0.0  ;;  %v3213_v46 = vor.u32 %v3212_v63, %v3208_v21  ;;  %v3217_v53 = vrot.slane %v3215_v9, 1  ;;  %v3227_v54 = vshll.u32 %v3139_v13, 16  ;;  %vm5396_vm13 = vmand %vm5375_vm12, %vm2500_vm4 }
 0x168   : > { %v5319_v26 = vcombine.low %v3050_v32, %v3057_v47  ;;  %v3220_v59 = vshrl.u32 %v5293_v35, 16  ;;  %v3224_v25 = vrot.slane %v3222_v55, 1  ;;  %v3323_v48 = vrot.slane %v5259_v42, 1 }
 0x169   : > { %v3218_v62 = vsel %vm3146_vm14, %v3213_v46, %v3217_v53  ;;  %v3229_v16 = vrot.slane %v3227_v54, 1  ;;  %v3117_v17 = vsel %vm5309_vm7, %v5085_v1, 0.0  ;;  %v3118_v20 = vsel %vm5275_vm15, %v5178_v24, 0.0  ;;  %vm2544_vm15 = vmand %vm5375_vm12, %vm2535_vm3  ;;  %v5696_v53 = vld [vmem:[#allocation2_spill] sm:$0xff] }
 0x16a   : > { %3277 = vrot.lane.b32.xlu0 %v3218_v62, %s4516_s26  ;;  %v3225_v34 = vor.u32 %v3224_v25, %v3220_v59  ;;  %v3119_v6 = vsel %vm2559_vm6, %v2983_v27, 0.0  ;;  %v5331_v30 = vpack.c.bf16 %v3118_v20, %v3117_v17  ;;  %v5333_v7 = vpack.c.bf16 %v3122_v44, %v3122_v44  ;;  %v5697_v20 = vld [vmem:[#allocation3_spill] sm:$0xff] }
 0x16b   : > { %v3324_v1 = vrot.slane %v3137_v22, 1  ;;  %v3326_v38 = vrot.slane %v5293_v35, 1  ;;  %v3141_v24 = vpack.c.bf16 %v3119_v6, %v3119_v6  ;;  %v3246_v15 = vshll.u32 %v5187_v61, 16  ;;  %v5698_v6 = vld [vmem:[#allocation4_spill] sm:$0xff] }
 0x16c   : > { %v3230_v3 = vsel %vm3146_vm14, %v3225_v34, %v3229_v16  ;;  %v3327_v57 = vrot.slane %v3139_v13, 1  ;;  %v3234_v56 = vshll.u32 %v5331_v30, 16  ;;  %v3251_v23 = vshll.u32 %v5333_v7, 16 }
 0x16d   : > { %3279 = vrot.lane.b32.xlu1 %v3230_v3, %s4516_s26  ;;  %v3325_v14 = vsel %vm3307_vm2, %v3323_v48, %v3324_v1  ;;  %v3239_v39 = vshll.u32 %v3141_v24, 16  ;;  %v3244_v12 = vshrl.u32 %v5187_v61, 16  ;;  %v3248_v22 = vrot.slane %v3246_v15, 1 }
 0x16e   : > { %v2778_v28 = vrot.slane %v2392_v43, %v4776_v29  ;;  %3348 = vrot.lane.b32.xlu0 %v3325_v14, %s4515_s25  ;;  %v3232_v10 = vshrl.u32 %v5331_v30, 16  ;;  %v3236_v19 = vrot.slane %v3234_v56, 1  ;;  %v3253_v9 = vrot.slane %v3251_v23, 1 }
 0x16f   : > { %v2275_v8 = vcombine.high %v5162_v18, %v5162_v18  ;;  %v3328_v31 = vsel %vm3307_vm2, %v3326_v38, %v3327_v57  ;;  %v3249_v49 = vor.u32 %v3248_v22, %v3244_v12  ;;  %v3150_v45 = vshll.u32 %v4904_v60, 16  ;;  %v4470_v57 = vld [vmem:[%s5646_s4 + $0x8] sm:$0x3f]  }
 0x170   : > { %v3237_v0 = vor.u32 %v3236_v19, %v3232_v10  ;;  %v3241_v32 = vrot.slane %v3239_v39, 1  ;;  %v3329_v43 = vrot.slane %v5331_v30, 1  ;;  %v3330_v21 = vrot.slane %v3141_v24, 1 }
 0x171   : > { %3350 = vrot.lane.b32.xlu1 %v3328_v31, %s4515_s25  ;;  %v3152_v18 = vrot.slane %v3150_v45, 1  ;;  %v3099_v13 = vsel %vm5355_vm10, %v4859_v58, 0.0  ;;  %v3100_v27 = vsel %vm5339_vm9, %v4907_v2, 0.0  ;;  %v3101_v47 = vsel %vm2541_vm11, %v2737_v41, 0.0 }
 0x172   : > { %v3242_v55 = vsel %vm3146_vm14, %v3237_v0, %v3241_v32  ;;  %v3254_v37 = vsel %vm3146_vm14, %v3249_v49, %v3253_v9  ;;  %v5388_v11 = vpack.c.bf16 %v3100_v27, %v3099_v13  ;;  %v5390_v44 = vpack.c.bf16 %v3101_v47, %v3101_v47 }
 0x173   : > { %v2455_v58 = vmax.f32 %v2275_v8, 0.0  ;;  %3281 = vrot.lane.b32.xlu0 %v3242_v55, %s4516_s26  ;;  %v3148_v2 = vshrl.u32 %v4904_v60, 16  ;;  %v3155_v41 = vshll.u32 %v4940_v36, 16  ;;  %v2465_v54 = vadd.s32 9, %v5696_v53 }
 0x174   : > { %v3331_v59 = vsel %vm3307_vm2, %v3329_v43, %v3330_v21  ;;  %v3332_v25 = vrot.slane %v5187_v61, 1  ;;  %v3333_v48 = vrot.slane %v5333_v7, 1  ;;  %v3162_v62 = vshll.u32 %v5388_v11, 16 }
 0x175   : > { %3283 = vrot.lane.b32.xlu1 %v3254_v37, %s4516_s26  ;;  %v3153_v16 = vor.u32 %v3152_v18, %v3148_v2  ;;  %v3160_v17 = vshrl.u32 %v5388_v11, 16  ;;  %v3102_v34 = vsel %vm5396_vm13, %v5697_v20, 0.0  ;;  %v3103_v52 = vsel %vm5375_vm12, %v5698_v6, 0.0  ;;  %v4472_v6 = vld [vmem:[%s5646_s4 + $0x10] sm:$0x3f]  }
 0x176   : > { %v3164_v1 = vrot.slane %v3162_v62, 1  ;;  %v3167_v38 = vshll.u32 %v5390_v44, 16  ;;  %v3104_v24 = vsel %vm2544_vm15, %v2778_v28, 0.0  ;;  %v5421_v7 = vpack.c.bf16 %v3103_v52, %v3102_v34 }
 0x177   : > { %v3065_v15 = vrot.slane %v2455_v58, %v4776_v29  ;;  %3352 = vrot.lane.b32.xlu0 %v3331_v59, %s4515_s25  ;;  %v3157_v3 = vrot.slane %v3155_v41, 1  ;;  %vm2479_vm5 = vcmp.ge.s32.totalorder %v2465_v54, 1  ;;  %vm2489_vm8 = vcmp.lt.s32.totalorder %v2465_v54, 17 }
 0x178   : > { %v3334_v56 = vsel %vm3307_vm2, %v3332_v25, %v3333_v48  ;;  %v3165_v23 = vor.u32 %v3164_v1, %v3160_v17  ;;  %v3131_v14 = vpack.c.bf16 %v3104_v24, %v3104_v24  ;;  %v3174_v39 = vshll.u32 %v5421_v7, 16  ;;  %vm2499_vm1 = vmand %vm2479_vm5, %vm2489_vm8 }
 0x179   : > { %3354 = vrot.lane.b32.xlu1 %v3334_v56, %s4515_s25  ;;  %v3158_v29 = vsel %vm3146_vm14, %v3153_v16, %v3157_v3  ;;  %v3308_v12 = vrot.slane %v4904_v60, 1  ;;  %vm2530_vm7 = vmand %vm2499_vm1, %vm2500_vm4  ;;  %v3124_v22 = vsel %vm2499_vm1, %v5319_v26, 0.0  ;;  %v3169_v33 = vrot.slane %v3167_v38, 1 }
 0x17a   : > { %v3176_v28 = vrot.slane %v3174_v39, 1  ;;  %vm2565_vm6 = vmand %vm2499_vm1, %vm2535_vm3  ;;  %v3123_v10 = vsel %vm2530_vm7, %v5287_v50, 0.0  ;;  %vm3427_vm9 = vcmask 1045504   ;;  %v3309_v19 = vrot.slane %v4940_v36, 1 }
 0x17b   : > { %3267 = vrot.lane.b32.xlu0 %v3158_v29, %s4516_s26  ;;  %v3311_v9 = vrot.slane %v5388_v11, 1  ;;  %v3125_v8 = vsel %vm2565_vm6, %v3065_v15, 0.0  ;;  %v5442_v31 = vpack.c.bf16 %v3124_v22, %v3123_v10  ;;  %4419 = vmatprep.subr.msk.bf16.mxu1 %vm3427_vm9, %v4470_v57  ;;  %v3170_v51 = vsel %vm3146_vm14, %v3165_v23, %v3169_v33 }
 0x17c   : > { %v3172_v50 = vshrl.u32 %v5421_v7, 16  ;;  %v3179_v26 = vshll.u32 %v3131_v14, 16  ;;  %v3145_v49 = vpack.c.bf16 %v3125_v8, %v3125_v8  ;;  %4418 = vmatprep.subr.msk.bf16.mxu0 %vm3427_vm9, %v4470_v57  ;;  %v3312_v36 = vrot.slane %v5390_v44, 1 }
 0x17d   : > { %3269 = vrot.lane.b32.xlu1 %v3170_v51, %s4516_s26  ;;  %v3258_v45 = vshll.u32 %v5442_v31, 16  ;;  %v3429_v0 = vsel %vm3427_vm9, %v4470_v57, 0  ;;  %v3310_v32 = vsel %vm3307_vm2, %v3308_v12, %v3309_v19  ;;  %v3314_v13 = vrot.slane %v5421_v7, 1 }
 0x17e   : > { %v3177_v43 = vor.u32 %v3176_v28, %v3172_v50  ;;  %4385 = vmatpush3.bf16.msra.mxu1 %v3429_v0  ;;  %4313 = vmatpush3.bf16.msra.mxu0 %v3429_v0  ;;  %v3313_v21 = vsel %vm3307_vm2, %v3311_v9, %v3312_v36  ;;  %v3181_v18 = vrot.slane %v3179_v26, 1  ;;  %v3256_v27 = vshrl.u32 %v5442_v31, 16  ;;  %v3808_v36 = vld [vmem:[%s5648_s6] sm:$0x3] }
 0x17f   : > { %3338 = vrot.lane.b32.xlu0 %v3310_v32, %s4515_s25  ;;  %v3260_v63 = vrot.slane %v3258_v45, 1  ;;  %4420 = vmatprep.subr.msk.bf16.mxu1 %vm3427_vm9, %v4471_v4  ;;  %v3263_v47 = vshll.u32 %v3145_v49, 16  ;;  %v3315_v37 = vrot.slane %v3131_v14, 1  ;;  %v3335_v2 = vrot.slane %v5442_v31, 1 }
 0x180   : > { %v3182_v55 = vsel %vm3146_vm14, %v3177_v43, %v3181_v18  ;;  %v3336_v53 = vrot.slane %v3145_v49, 1  ;;  %vm3358_vm3 = vcmask 31744   ;;  %vm3379_vm4 = vcmask 64512  }
 0x181   : > { %3340 = vrot.lane.b32.xlu1 %v3313_v21, %s4515_s25  ;;  %v3261_v44 = vor.u32 %v3260_v63, %v3256_v27  ;;  %v3316_v46 = vsel %vm3307_vm2, %v3314_v13, %v3315_v37  ;;  %v3265_v58 = vrot.slane %v3263_v47, 1  ;;  %vm3410_vm10 = vcmask 97280  }
 0x182   : > { %v3337_v54 = vsel %vm3307_vm2, %v3335_v2, %v3336_v53  ;;  %v3536_v34 = vsel %vm3427_vm9, %v4471_v4, 0  ;;  %vm3840_vm2 = vcmask 1041408  }
 0x183   : > { %3271 = vrot.lane.b32.xlu0 %v3182_v55, %s4516_s26  ;;  %v3266_v41 = vsel %vm3146_vm14, %v3261_v44, %v3265_v58  ;;  %4422 = vmatprep.subr.msk.bf16.mxu0 %vm3840_vm2, %v3808_v36  ;;  %v3842_v45 = vsel %vm3840_vm2, %v3808_v36, 0 }
 0x185   : > { %3342 = vrot.lane.b32.xlu1 %v3316_v46, %s4515_s25 }
 0x187   : > { %3285 = vrot.lane.b32.xlu0 %v3266_v41, %s4516_s26 }
 0x189   : > { %3356 = vrot.lane.b32.xlu1 %v3337_v54, %s4515_s25  ;;  %s4134_s25 = sshll.u32 %s369_s23, 3 }
 0x18a   : > { %s5551_s12 = scalar_lea.vmem %s5643_s1, %s4134_s25  ;;  %s5568_s15 = scalar_lea.vmem %s5650_s8, %s4134_s25 }
 0x1c3   : > { %v3345_v59 = vpop.permute.xlu1 %3344 }
 0x1ce   : > { %v3347_v17 = vpop.permute.xlu1 %3346 }
 0x1d1   : > { %v3274_v25 = vpop.permute.xlu0 %3273 }
 0x1d2   : > { %v3366_v48 = vsel %vm3358_vm3, %v5091_v40, %v3274_v25 }
 0x1d3   : > { %v3387_v62 = vsel %vm3379_vm4, %v3366_v48, %v3345_v59 }
 0x1d4   : > { %4318 = vmatprep.mubr.msk.bf16.mxu1 %vm3410_vm10, %v3387_v62 }
 0x1d5   : > { %v3276_v16 = vpop.permute.xlu0 %3275 }
 0x1d6   : > { %v3368_v20 = vsel %vm3358_vm3, %v5189_v5, %v3276_v16 }
 0x1d7   : > { %v3389_v52 = vsel %vm3379_vm4, %v3368_v20, %v3347_v17 }
 0x1d8   : > { %4319 = vmatmul.mubr.msk.bf16.vlgmr.msra.gmra.mrb[0].mxu1 %vm3410_vm10, %v3389_v52 }
 0x1d9   : > { %4331 = vmatpush3.bf16.msra.mxu1 %v3536_v34 }
 0x1da   : > { %4421 = vmatprep.subr.msk.bf16.mxu1 %vm3427_vm9, %v4472_v6 }
 0x1dc   : > { %v3278_v40 = vpop.permute.xlu0 %3277 }
 0x1dd   : > { %v3370_v38 = vsel %vm3358_vm3, %v5259_v42, %v3278_v40 }
 0x1df   : > { %v3280_v1 = vpop.permute.xlu1 %3279 }
 0x1e0   : > { %v3349_v24 = vpop.permute.xlu0 %3348  ;;  %v3372_v15 = vsel %vm3358_vm3, %v5293_v35, %v3280_v1 }
 0x1e1   : > { %v3391_v5 = vsel %vm3379_vm4, %v3370_v38, %v3349_v24 }
 0x1e2   : > { %4322 = vmatprep.mubr.msk.bf16.mxu1 %vm3410_vm10, %v3391_v5 }
 0x1e3   : > { %v3351_v3 = vpop.permute.xlu1 %3350 }
 0x1e4   : > { %v3393_v57 = vsel %vm3379_vm4, %v3372_v15, %v3351_v3 }
 0x1e5   : > { %4323 = vmatmul.mubr.msk.bf16.gmra.mrb[4].mxu1 %vm3410_vm10, %v3393_v57  ;;  %v3282_v56 = vpop.permute.xlu0 %3281 }
 0x1e6   : > { %v3374_v14 = vsel %vm3358_vm3, %v5331_v30, %v3282_v56 }
 0x1e7   : > { %v3284_v23 = vpop.permute.xlu1 %3283 }
 0x1e8   : > { %v3376_v29 = vsel %vm3358_vm3, %v5187_v61, %v3284_v23  ;;  %v3646_v61 = vsel %vm3427_vm9, %v4472_v6, 0 }
 0x1e9   : > { %v3353_v39 = vpop.permute.xlu0 %3352 }
 0x1ea   : > { %v3395_v42 = vsel %vm3379_vm4, %v3374_v14, %v3353_v39 }
 0x1eb   : > { %v3355_v12 = vpop.permute.xlu1 %3354  ;;  %4326 = vmatprep.mubr.msk.bf16.mxu1 %vm3410_vm10, %v3395_v42 }
 0x1ec   : > { %v3397_v35 = vsel %vm3379_vm4, %v3376_v29, %v3355_v12 }
 0x1ed   : > { %4327 = vmatmul.mubr.msk.bf16.gmra.mrb[8].mxu1 %vm3410_vm10, %v3397_v35  ;;  %v3268_v22 = vpop.permute.xlu0 %3267 }
 0x1ee   : > { %v3360_v28 = vsel %vm3358_vm3, %v4904_v60, %v3268_v22 }
 0x1ef   : > { %v3270_v33 = vpop.permute.xlu1 %3269 }
 0x1f0   : > { %v3362_v19 = vsel %vm3358_vm3, %v5388_v11, %v3270_v33 }
 0x1f1   : > { %v3339_v10 = vpop.permute.xlu0 %3338 }
 0x1f2   : > { %v3381_v30 = vsel %vm3379_vm4, %v3360_v28, %v3339_v10 }
 0x1f3   : > { %v3341_v9 = vpop.permute.xlu1 %3340  ;;  %4332 = vmatprep.mubr.msk.bf16.mxu1 %vm3410_vm10, %v3381_v30 }
 0x1f4   : > { %v3383_v8 = vsel %vm3379_vm4, %v3362_v19, %v3341_v9 }
 0x1f5   : > { %4314 = vmatprep.mubr.msk.bf16.mxu0 %vm3410_vm10, %v3383_v8  ;;  %4333 = vmatmul.mubr.msk.bf16.vlgmr.msra.gmra.mrb[12].mxu1 %vm3410_vm10, %v3383_v8  ;;  %v3272_v4 = vpop.permute.xlu0 %3271 }
 0x1f6   : > { %4349 = vmatpush3.bf16.msra.mxu1 %v3646_v61  ;;  %v3364_v60 = vsel %vm3358_vm3, %v5421_v7, %v3272_v4 }
 0x1f7   : > { %v3343_v51 = vpop.permute.xlu1 %3342 }
 0x1f8   : > { %v3385_v50 = vsel %vm3379_vm4, %v3364_v60, %v3343_v51 }
 0x1f9   : > { %4315 = vmatmul.mubr.msk.bf16.vlgmr.msra.gmra.mrb[24].mxu0 %vm3410_vm10, %v3385_v50  ;;  %4336 = vmatprep.mubr.msk.bf16.mxu1 %vm3410_vm10, %v3385_v50  ;;  %v3286_v11 = vpop.permute.xlu0 %3285 }
 0x1fa   : > { %v3378_v7 = vsel %vm3358_vm3, %v5442_v31, %v3286_v11  ;;  %4367 = vmatpush3.bf16.msra.mxu0 %v3842_v45  ;;  %v4225_v31 = vld [vmem:[%s5647_s5] ss:$0 sm:$0xff] }
 0x1fb   : > { %v3357_v26 = vpop.permute.xlu1 %3356 }
 0x1fc   : > { %v3399_v49 = vsel %vm3379_vm4, %v3378_v7, %v3357_v26 }
 0x1fd   : > { %4337 = vmatmul.mubr.msk.bf16.gmra.mrb[0].mxu1 %vm3410_vm10, %v3387_v62 }
 0x1fe   : > { %4340 = vmatprep.mubr.msk.bf16.mxu1 %vm3410_vm10, %v3389_v52 }
 0x205   : > { %4341 = vmatmul.mubr.msk.bf16.gmra.mrb[4].mxu1 %vm3410_vm10, %v3391_v5 }
 0x206   : > { %4344 = vmatprep.mubr.msk.bf16.mxu1 %vm3410_vm10, %v3393_v57 }
 0x20d   : > { %4345 = vmatmul.mubr.msk.bf16.gmra.mrb[8].mxu1 %vm3410_vm10, %v3395_v42 }
 0x20e   : > { %4350 = vmatprep.mubr.msk.bf16.mxu1 %vm3410_vm10, %v3385_v50 }
 0x215   : > { %4351 = vmatmul.mubr.msk.bf16.vlgmr.msra.gmra.mrb[12].mxu1 %vm3410_vm10, %v3387_v62 }
 0x216   : > { %4354 = vmatprep.mubr.msk.bf16.mxu1 %vm3410_vm10, %v3389_v52 }
 0x21d   : > { %4355 = vmatmul.mubr.msk.bf16.gmra.mrb[0].mxu1 %vm3410_vm10, %v3391_v5 }
 0x21e   : > { %4358 = vmatprep.mubr.msk.bf16.mxu1 %vm3410_vm10, %v3393_v57 }
 0x225   : > { %4359 = vmatmul.mubr.msk.bf16.gmra.mrb[4].mxu1 %vm3410_vm10, %v3395_v42 }
 0x226   : > { %4362 = vmatprep.mubr.msk.bf16.mxu1 %vm3410_vm10, %v3397_v35 }
 0x22d   : > { %4363 = vmatmul.mubr.msk.bf16.gmra.mrb[8].mxu1 %vm3410_vm10, %v3399_v49 }
 0x2cc   : > { %v4316_v0 = vpop.f32.mrb[24].mxu0 }
 0x2cd   : > { %v3465_v32 = vpop.f32.mrb[25].mxu0 }
 0x2ce   : > { %v4317_v43 = vpop.f32.mrb[26].mxu0 }
 0x2cf   : > { %v3468_v21 = vpop.f32.mrb[27].mxu0 }
 0x2e8   : > { %v4352_v63 = vpop.f32.mrb[12].mxu1 }
 0x2e9   : > { %v4386_v18 = vadd.f32 %v4352_v63, %v4316_v0  ;;  %v3682_v13 = vpop.f32.mrb[13].mxu1 }
 0x2ea   : > { %v4387_v27 = vadd.f32 %v3682_v13, %v3465_v32  ;;  %v4353_v47 = vpop.f32.mrb[14].mxu1  ;;  %v5556_v32 = vld [vmem:[%s5649_s7] ss:$0 sm:$0xff] }
 0x2eb   : > { %v3770_v55 = vadd.f32 %v4386_v18, %v4225_v31  ;;  %v4388_v37 = vadd.f32 %v4353_v47, %v4317_v43  ;;  %v3685_v44 = vpop.f32.mrb[15].mxu1  ;;  %v3941_v18 = vld [vmem:[%s5551_s12] sm:$0xff]  ;;  %v3944_v47 = vld [vmem:[%s5551_s12 + $0x18] sm:$0xff] }
 0x2ec   : > { %v3768_v46 = vadd.f32 %v4387_v27, %v4225_v31  ;;  %v4389_v58 = vadd.f32 %v3685_v44, %v3468_v21  ;;  %v3943_v21 = vld [vmem:[%s5551_s12 + $0x10] sm:$0xff] }
 0x2ed   : > { %v3771_v2 = vadd.f32 %v4388_v37, %v4225_v31  ;;  %v3786_v53 = vmax.f32 %v3770_v55, 0.0 }
 0x2ee   : > { %v3769_v41 = vadd.f32 %v4389_v58, %v4225_v31  ;;  %v3784_v59 = vmax.f32 %v3768_v46, 0.0  ;;  %v3942_v46 = vld [vmem:[%s5551_s12 + $0x8] sm:$0xff] }
 0x2ef   : > { %v3787_v54 = vmax.f32 %v3771_v2, 0.0 }
 0x2f0   : > { %v3785_v25 = vmax.f32 %v3769_v41, 0.0  ;;  %v4356_v48 = vpop.f32.mrb[0].mxu1 }
 0x2f1   : > { %v3801_v62 = vpack.c.bf16 %v3787_v54, %v3786_v53  ;;  %v3774_v16 = vadd.f32 %v4356_v48, %v4225_v31  ;;  %v3698_v17 = vpop.f32.mrb[1].mxu1 }
 0x2f2   : > { %v3800_v20 = vpack.c.bf16 %v3785_v25, %v3784_v59  ;;  %v3772_v34 = vadd.f32 %v4225_v31, %v3698_v17  ;;  %v4357_v6 = vpop.f32.mrb[2].mxu1 }
 0x2f3   : > { %v3775_v52 = vadd.f32 %v4357_v6, %v4225_v31  ;;  %v3701_v40 = vpop.f32.mrb[3].mxu1  ;;  %v3790_v38 = vmax.f32 %v3774_v16, 0.0  ;;  %v3947_v16 = vld [vmem:[%s5551_s12 + $0x30] sm:$0xff] }
 0x2f4   : > { %v3773_v1 = vadd.f32 %v4225_v31, %v3701_v40  ;;  %4368 = vmatprep.mubr.msk.bf16.mxu0 %vm3358_vm3, %v3800_v20  ;;  %v3788_v5 = vmax.f32 %v3772_v34, 0.0  ;;  %v3945_v34 = vld [vmem:[%s5551_s12 + $0x20] sm:$0xff]  ;;  %v3948_v40 = vld [vmem:[%s5551_s12 + $0x38] sm:$0xff] }
 0x2f5   : > { %v3791_v24 = vmax.f32 %v3775_v52, 0.0  ;;  %4369 = vmatmul.mubr.msk.bf16.vlgmr.msra.gmra.mrb[28].mxu0 %vm3358_vm3, %v3801_v62 }
 0x2f6   : > { %v3789_v15 = vmax.f32 %v3773_v1, 0.0 }
 0x2f7   : > { %v3803_v3 = vpack.c.bf16 %v3791_v24, %v3790_v38 }
 0x2f8   : > { %v3802_v57 = vpack.c.bf16 %v3789_v15, %v3788_v5  ;;  %v4360_v56 = vpop.f32.mrb[4].mxu1  ;;  %v3946_v5 = vld [vmem:[%s5551_s12 + $0x28] sm:$0xff] }
 0x2f9   : > { %v3778_v23 = vadd.f32 %v4360_v56, %v4225_v31  ;;  %v3714_v14 = vpop.f32.mrb[5].mxu1 }
 0x2fa   : > { %v3776_v39 = vadd.f32 %v4225_v31, %v3714_v14  ;;  %v4361_v42 = vpop.f32.mrb[6].mxu1  ;;  %4372 = vmatprep.mubr.msk.bf16.mxu0 %vm3358_vm3, %v3802_v57 }
 0x2fb   : > { %v3779_v29 = vadd.f32 %v4361_v42, %v4225_v31  ;;  %v3717_v12 = vpop.f32.mrb[7].mxu1  ;;  %v3794_v22 = vmax.f32 %v3778_v23, 0.0 }
 0x2fc   : > { %v3777_v35 = vadd.f32 %v4225_v31, %v3717_v12  ;;  %v3792_v28 = vmax.f32 %v3776_v39, 0.0  ;;  %v3951_v12 = vld [vmem:[%s5551_s12 + $0x50] sm:$0xff] }
 0x2fd   : > { %v3795_v33 = vmax.f32 %v3779_v29, 0.0  ;;  %4373 = vmatmul.mubr.msk.bf16.gmra.mrb[32].mxu0 %vm3358_vm3, %v3803_v3 }
 0x2fe   : > { %v3793_v10 = vmax.f32 %v3777_v35, 0.0 }
 0x2ff   : > { %v3805_v30 = vpack.c.bf16 %v3795_v33, %v3794_v22  ;;  %v3949_v33 = vld [vmem:[%s5551_s12 + $0x40] sm:$0xff] }
 0x300   : > { %v3804_v19 = vpack.c.bf16 %v3793_v10, %v3792_v28  ;;  %v4364_v9 = vpop.f32.mrb[8].mxu1 }
 0x301   : > { %v3782_v61 = vadd.f32 %v4364_v9, %v4225_v31  ;;  %v3730_v8 = vpop.f32.mrb[9].mxu1 }
 0x302   : > { %v3780_v4 = vadd.f32 %v4225_v31, %v3730_v8  ;;  %v4365_v60 = vpop.f32.mrb[10].mxu1  ;;  %4376 = vmatprep.mubr.msk.bf16.mxu0 %vm3358_vm3, %v3804_v19  ;;  %v3950_v8 = vld [vmem:[%s5551_s12 + $0x48] sm:$0xff] }
 0x303   : > { %v3783_v51 = vadd.f32 %v4365_v60, %v4225_v31  ;;  %v3733_v50 = vpop.f32.mrb[11].mxu1  ;;  %v3798_v7 = vmax.f32 %v3782_v61, 0.0 }
 0x304   : > { %v3781_v11 = vadd.f32 %v4225_v31, %v3733_v50  ;;  %v3796_v49 = vmax.f32 %v3780_v4, 0.0 }
 0x305   : > { %v3799_v26 = vmax.f32 %v3783_v51, 0.0  ;;  %4377 = vmatmul.mubr.msk.bf16.gmra.mrb[36].mxu0 %vm3358_vm3, %v3805_v30  ;;  %v3952_v30 = vld [vmem:[%s5551_s12 + $0x58] sm:$0xff] }
 0x306   : > { %v3797_v36 = vmax.f32 %v3781_v11, 0.0 }
 0x307   : > { %v3807_v45 = vpack.c.bf16 %v3799_v26, %v3798_v7 }
 0x308   : > { %v3806_v0 = vpack.c.bf16 %v3797_v36, %v3796_v49 }
 0x30a   : > { %4380 = vmatprep.mubr.msk.bf16.mxu0 %vm3358_vm3, %v3806_v0 }
 0x30d   : > { %4381 = vmatmul.mubr.msk.bf16.gmra.mrb[40].mxu0 %vm3358_vm3, %v3807_v45  ;;  %v3955_v45 = vld [vmem:[%s5551_s12 + $0x70] sm:$0xff] }
 0x3c8   : > { %v4370_v43 = vpop.f32.mrb[28].mxu0 }
 0x3c9   : > { %v3887_v63 = vadd.f32 %v4370_v43, %v5556_v32  ;;  %v3878_v31 = vpop.f32.mrb[29].mxu0 }
 0x3ca   : > { %v3879_v13 = vadd.f32 %v5556_v32, %v3878_v31  ;;  %v4371_v27 = vpop.f32.mrb[30].mxu0 }
 0x3cb   : > { %v3959_v55 = vadd.f32 %v3943_v21, %v3887_v63  ;;  %v3890_v37 = vadd.f32 %v4371_v27, %v5556_v32  ;;  %v3881_v44 = vpop.f32.mrb[31].mxu0  ;;  %v3953_v21 = vld [vmem:[%s5551_s12 + $0x60] sm:$0xff] }
 0x3cc   : > { %v3957_v58 = vadd.f32 %v3941_v18, %v3879_v13  ;;  %v3882_v2 = vadd.f32 %v5556_v32, %v3881_v44  ;;  %v3956_v18 = vld [vmem:[%s5551_s12 + $0x78] sm:$0xff] }
 0x3cd   : > { %v3975_v41 = vmax.f32 %v3959_v55, 0.0  ;;  %v3960_v53 = vadd.f32 %v3944_v47, %v3890_v37  ;;  %v3954_v55 = vld [vmem:[%s5551_s12 + $0x68] sm:$0xff] }
 0x3ce   : > { %v3973_v54 = vmax.f32 %v3957_v58, 0.0  ;;  %v3958_v59 = vadd.f32 %v3942_v46, %v3882_v2 }
 0x3cf   : > { %3991 = vst.msk [vmem:[%s5568_s15 + $0x10] sm:$0xff] %vm1706_vm0, %v3975_v41  ;;  %v3976_v25 = vmax.f32 %v3960_v53, 0.0 }
 0x3d0   : > { %3989 = vst.msk [vmem:[%s5568_s15] sm:$0xff] %vm1706_vm0, %v3973_v54  ;;  %v3974_v48 = vmax.f32 %v3958_v59, 0.0  ;;  %v4374_v62 = vpop.f32.mrb[32].mxu0 }
 0x3d1   : > { %3992 = vst.msk [vmem:[%s5568_s15 + $0x18] sm:$0xff] %vm1706_vm0, %v3976_v25  ;;  %v3903_v17 = vadd.f32 %v4374_v62, %v5556_v32  ;;  %v3894_v20 = vpop.f32.mrb[33].mxu0 }
 0x3d2   : > { %3990 = vst.msk [vmem:[%s5568_s15 + $0x8] sm:$0xff] %vm1706_vm0, %v3974_v48  ;;  %v3895_v6 = vadd.f32 %v5556_v32, %v3894_v20  ;;  %v4375_v52 = vpop.f32.mrb[34].mxu0 }
 0x3d3   : > { %v3963_v1 = vadd.f32 %v3947_v16, %v3903_v17  ;;  %v3906_v38 = vadd.f32 %v4375_v52, %v5556_v32  ;;  %v3897_v24 = vpop.f32.mrb[35].mxu0 }
 0x3d4   : > { %v3961_v15 = vadd.f32 %v3945_v34, %v3895_v6  ;;  %v3898_v3 = vadd.f32 %v5556_v32, %v3897_v24 }
 0x3d5   : > { %v3979_v57 = vmax.f32 %v3963_v1, 0.0  ;;  %v3964_v56 = vadd.f32 %v3948_v40, %v3906_v38 }
 0x3d6   : > { %v3977_v23 = vmax.f32 %v3961_v15, 0.0  ;;  %v3962_v14 = vadd.f32 %v3946_v5, %v3898_v3 }
 0x3d7   : > { %3995 = vst.msk [vmem:[%s5568_s15 + $0x30] sm:$0xff] %vm1706_vm0, %v3979_v57  ;;  %v3980_v39 = vmax.f32 %v3964_v56, 0.0 }
 0x3d8   : > { %3993 = vst.msk [vmem:[%s5568_s15 + $0x20] sm:$0xff] %vm1706_vm0, %v3977_v23  ;;  %v3978_v42 = vmax.f32 %v3962_v14, 0.0  ;;  %v4378_v29 = vpop.f32.mrb[36].mxu0 }
 0x3d9   : > { %3996 = vst.msk [vmem:[%s5568_s15 + $0x38] sm:$0xff] %vm1706_vm0, %v3980_v39  ;;  %v3919_v35 = vadd.f32 %v4378_v29, %v5556_v32  ;;  %v3910_v22 = vpop.f32.mrb[37].mxu0 }
 0x3da   : > { %3994 = vst.msk [vmem:[%s5568_s15 + $0x28] sm:$0xff] %vm1706_vm0, %v3978_v42  ;;  %v3911_v28 = vadd.f32 %v5556_v32, %v3910_v22  ;;  %v4379_v10 = vpop.f32.mrb[38].mxu0 }
 0x3db   : > { %v3967_v19 = vadd.f32 %v3951_v12, %v3919_v35  ;;  %v3922_v9 = vadd.f32 %v4379_v10, %v5556_v32  ;;  %v3913_v61 = vpop.f32.mrb[39].mxu0 }
 0x3dc   : > { %v3965_v4 = vadd.f32 %v3949_v33, %v3911_v28  ;;  %v3914_v60 = vadd.f32 %v5556_v32, %v3913_v61 }
 0x3dd   : > { %v3983_v51 = vmax.f32 %v3967_v19, 0.0  ;;  %v3968_v50 = vadd.f32 %v3952_v30, %v3922_v9 }
 0x3de   : > { %v3981_v11 = vmax.f32 %v3965_v4, 0.0  ;;  %v3966_v7 = vadd.f32 %v3950_v8, %v3914_v60 }
 0x3df   : > { %3999 = vst.msk [vmem:[%s5568_s15 + $0x50] sm:$0xff] %vm1706_vm0, %v3983_v51  ;;  %v3984_v26 = vmax.f32 %v3968_v50, 0.0 }
 0x3e0   : > { %3997 = vst.msk [vmem:[%s5568_s15 + $0x40] sm:$0xff] %vm1706_vm0, %v3981_v11  ;;  %v3982_v49 = vmax.f32 %v3966_v7, 0.0  ;;  %v4382_v36 = vpop.f32.mrb[40].mxu0 }
 0x3e1   : > { %4000 = vst.msk [vmem:[%s5568_s15 + $0x58] sm:$0xff] %vm1706_vm0, %v3984_v26  ;;  %v3935_v0 = vadd.f32 %v4382_v36, %v5556_v32  ;;  %v3926_v43 = vpop.f32.mrb[41].mxu0 }
 0x3e2   : > { %3998 = vst.msk [vmem:[%s5568_s15 + $0x48] sm:$0xff] %vm1706_vm0, %v3982_v49  ;;  %v3927_v63 = vadd.f32 %v5556_v32, %v3926_v43  ;;  %v4383_v31 = vpop.f32.mrb[42].mxu0 }
 0x3e3   : > { %v3971_v13 = vadd.f32 %v3955_v45, %v3935_v0  ;;  %v3938_v27 = vadd.f32 %v4383_v31, %v5556_v32  ;;  %v3929_v47 = vpop.f32.mrb[43].mxu0 }
 0x3e4   : > { %v3969_v37 = vadd.f32 %v3953_v21, %v3927_v63  ;;  %v3930_v44 = vadd.f32 %v5556_v32, %v3929_v47 }
 0x3e5   : > { %v3987_v46 = vmax.f32 %v3971_v13, 0.0  ;;  %v3972_v58 = vadd.f32 %v3956_v18, %v3938_v27 }
 0x3e6   : > { %v3985_v2 = vmax.f32 %v3969_v37, 0.0  ;;  %v3970_v41 = vadd.f32 %v3954_v55, %v3930_v44 }
 0x3e7   : > { %4003 = vst.msk [vmem:[%s5568_s15 + $0x70] sm:$0xff] %vm1706_vm0, %v3987_v46  ;;  %v3988_v53 = vmax.f32 %v3972_v58, 0.0 }
 0x3e8   : > { %4001 = vst.msk [vmem:[%s5568_s15 + $0x60] sm:$0xff] %vm1706_vm0, %v3985_v2  ;;  %v3986_v54 = vmax.f32 %v3970_v41, 0.0 }
 0x3e9   : > { %4004 = vst.msk [vmem:[%s5568_s15 + $0x78] sm:$0xff] %vm1706_vm0, %v3988_v53 }
 0x3ea   : > { %4002 = vst.msk [vmem:[%s5568_s15 + $0x68] sm:$0xff] %vm1706_vm0, %v3986_v54 }
 0x3eb PF: > { %s18_s9 = sadd.s32 1, %s4511_s9   ;;  %s5699_s27 = smov %s4503_s29 }
 0x3ec   : > { %p15_p8 = scmp.ge.s32.totalorder %s18_s9, 6   ;;  %s5700_s28 = smov %s4507_s30 }
 0x3ed   : > { %s5701_s29 = smov %s5704_s10  ;;  %s5702_s30 = smov %s5708_s11 }
 0x3ee   :  { %17 = sbr.rel (!%p15_p8) target bundleno = 3 (0x3), region = 87 }

</bundles_post_ra>
